<compile_context>
chip_gen: v5e
topology: v5e:2x2
jax: 0.10.0
libtpu: 0.0.40
codegen_flags: <defaults>
</compile_context>

<pallas_src>
import jax
import jax.numpy as jnp
import numpy as np
from jax.experimental import pallas as pl
from jax.experimental.pallas import tpu as pltpu

N_MFCCS = 16                      # config['n_mfccs']
HIDDEN = 2 * N_MFCCS              # LSTM hidden size = 32
NUM_LAYERS = 3


def lstm_classifier_kernel(gates0_ref,   # (T, B, 12H) per-step additive gate term
                           wbig_ref,     # (3H, 12H)   fused block recurrent weight
                           wlin_ref,     # (1, H)
                           blin_ref,     # (1, 1)
                           out_ref):     # (B, 1)
    T, B, _ = gates0_ref.shape
    H3 = wbig_ref.shape[0]        # 3H
    H = H3 // 3

    def range_mask(lo, hi):
        lane = jax.lax.broadcasted_iota(jnp.int32, (1, H3), 1)
        return jnp.logical_and(lane >= lo, lane < hi)

    def wave_step(hpack, cpack, t, mask=None):
        # One fused MXU matmul for all three layers' recurrent contributions.
        # gates0_ref[t] already holds x_t @ W_ih0^T + b0 (layer-0 columns) and b1/b2
        # (layer-1/2 columns), so no further bias work is needed per step.
        gates = jnp.dot(hpack, wbig_ref[...], preferred_element_type=jnp.float32)
        gates = gates + gates0_ref[t]
        sg = jax.nn.sigmoid(gates)                     # single EUP push over (B, 12H)
        i_all = sg[:, 0 * H3:1 * H3]
        f_all = sg[:, 1 * H3:2 * H3]
        g_all = 2.0 * sg[:, 2 * H3:3 * H3] - 1.0       # == tanh(original g preact)
        o_all = sg[:, 3 * H3:4 * H3]
        c_new = f_all * cpack + i_all * g_all
        h_new = o_all * jnp.tanh(c_new)                # second (last) EUP push
        if mask is not None:                           # warmup / drain only
            h_new = jnp.where(mask, h_new, hpack)
            c_new = jnp.where(mask, c_new, cpack)
        return h_new, c_new

    zero = jnp.zeros((B, H3), jnp.float32)

    # Warmup: step 0 commits layer 0 only; step 1 commits layers 0 and 1.
    h, c = wave_step(zero, zero, 0, range_mask(0, H))
    h, c = wave_step(h, c, 1, range_mask(0, 2 * H))

    # Steady: steps 2 .. T-1, all layers valid -> no masks, no index clamping.
    def steady(s, carry):
        hh, cc = carry
        return wave_step(hh, cc, s)

    n_steady = T - 2
    h, c = jax.lax.fori_loop(2, T, steady, (h, c),
                             unroll=(True if n_steady <= 16 else 8))

    # Drain: step T commits layers 1,2; step T+1 commits layer 2.  gates0 row T-1
    # still supplies the folded b1/b2; the stale layer-0 columns are masked away.
    h, c = wave_step(h, c, T - 1, range_mask(H, 3 * H))
    h, c = wave_step(h, c, T - 1, range_mask(2 * H, 3 * H))

    # Epilogue (one-time): Linear(H -> 1) on layer-2 hidden at t = T-1, ReLU, sigmoid.
    h2 = h[:, 2 * H:3 * H]
    logits = jnp.sum(h2 * wlin_ref[...], axis=-1, keepdims=True) + blin_ref[...]
    out_ref[...] = jax.nn.sigmoid(jnp.maximum(logits, 0.0))


def init_params(key, n_mfccs=N_MFCCS):
    """Deterministic synthetic params with PyTorch LSTM/Linear shapes."""
    H = 2 * n_mfccs
    params = {}
    scale = 1.0 / np.sqrt(H)
    for layer in range(NUM_LAYERS):
        in_dim = n_mfccs if layer == 0 else H
        key, k1, k2, k3, k4 = jax.random.split(key, 5)
        params[f"w_ih_{layer}"] = scale * jax.random.normal(k1, (4 * H, in_dim), jnp.float32)
        params[f"w_hh_{layer}"] = scale * jax.random.normal(k2, (4 * H, H), jnp.float32)
        params[f"b_ih_{layer}"] = scale * jax.random.normal(k3, (4 * H,), jnp.float32)
        params[f"b_hh_{layer}"] = scale * jax.random.normal(k4, (4 * H,), jnp.float32)
    key, k1, k2 = jax.random.split(key, 3)
    params["lin_w"] = scale * jax.random.normal(k1, (1, H), jnp.float32)   # (out=1, in=H)
    params["lin_b"] = scale * jax.random.normal(k2, (1,), jnp.float32)
    return params


def gender_classifier_rnn(x, params):
    """x: (B, T, n_mfccs) -- same as PyTorch batch_first input. Returns (B, 1)."""
    x = x.astype(jnp.float32)
    B, T, I = x.shape
    H = 2 * I
    if T < 2:
        raise ValueError("kernel assumes seq_len >= 2")

    # Pre-scale the g-gate (PyTorch gate order i, f, g, o -> block [2H:3H]) by 2 so the
    # kernel can use tanh(z) = 2*sigmoid(2z) - 1 with a single full-width sigmoid.
    gate_scale = jnp.ones((4 * H,), jnp.float32).at[2 * H:3 * H].set(2.0)

    def prep(layer):
        wih = params[f"w_ih_{layer}"] * gate_scale[:, None]     # (4H, in)
        whh = params[f"w_hh_{layer}"] * gate_scale[:, None]     # (4H, H)
        b = ((params[f"b_ih_{layer}"] + params[f"b_hh_{layer}"]) * gate_scale
             ).reshape(1, 4 * H)
        return wih.T, whh.T, b                                   # (in,4H), (H,4H), (1,4H)

    wih0T, whh0T, b0 = prep(0)
    wih1T, whh1T, b1 = prep(1)
    wih2T, whh2T, b2 = prep(2)

    def place(block_4h, layer):
        """Scatter a (..., 4H) block (gate order i,f,g,o) into the gate-type-major
        (..., 12H) layout at `layer`'s column positions."""
        out = jnp.zeros(block_4h.shape[:-1] + (12 * H,), jnp.float32)
        for gi in range(4):
            out = out.at[..., gi * 3 * H + layer * H:
                              gi * 3 * H + (layer + 1) * H].set(
                block_4h[..., gi * H:(gi + 1) * H])
        return out

    # Fused block recurrent weight: rows = packed [h0|h1|h2], columns gate-type-major.
    wbig = jnp.zeros((3 * H, 12 * H), jnp.float32)
    wbig = wbig.at[0 * H:1 * H].add(place(whh0T, 0))   # layer0 recurrence (reads h0)
    wbig = wbig.at[0 * H:1 * H].add(place(wih1T, 1))   # layer1 input      (reads h0)
    wbig = wbig.at[1 * H:2 * H].add(place(whh1T, 1))   # layer1 recurrence (reads h1)
    wbig = wbig.at[1 * H:2 * H].add(place(wih2T, 2))   # layer2 input      (reads h1)
    wbig = wbig.at[2 * H:3 * H].add(place(whh2T, 2))   # layer2 recurrence (reads h2)

    # Per-timestep additive gate term: layer-0 input projection for all timesteps
    # (one big matmul) plus b1/b2 folded into every row -> no per-step bias adds.
    x_tbi = jnp.transpose(x, (1, 0, 2)).reshape(T * B, I)        # (T*B, I)
    g0_raw = x_tbi @ wih0T + b0                                  # (T*B, 4H)
    gates0 = place(g0_raw, 0).reshape(T, B, 12 * H)
    gates0 = gates0 + place(b1, 1) + place(b2, 2)                # (T, B, 12H)

    wlin = params["lin_w"].reshape(1, H)
    blin = params["lin_b"].reshape(1, 1)

    vmem = pl.BlockSpec(memory_space=pltpu.MemorySpace.VMEM)
    out = pl.pallas_call(
        lstm_classifier_kernel,
        out_shape=jax.ShapeDtypeStruct((B, 1), jnp.float32),
        in_specs=[vmem, vmem, vmem, vmem],
        out_specs=vmem,
    )(gates0, wbig, wlin, blin)
    return out


def reference_forward(x, params):
    """Pure-JAX reference mirroring the PyTorch module, for correctness check."""
    x = x.astype(jnp.float32)
    B, T, I = x.shape
    H = 2 * I
    inp = x
    for layer in range(NUM_LAYERS):
        wih = params[f"w_ih_{layer}"]
        whh = params[f"w_hh_{layer}"]
        b = params[f"b_ih_{layer}"] + params[f"b_hh_{layer}"]
        h = jnp.zeros((B, H), jnp.float32)
        c = jnp.zeros((B, H), jnp.float32)
        outs = []
        for t in range(T):
            gates = inp[:, t] @ wih.T + h @ whh.T + b
            i = jax.nn.sigmoid(gates[:, 0 * H:1 * H])
            f = jax.nn.sigmoid(gates[:, 1 * H:2 * H])
            g = jnp.tanh(gates[:, 2 * H:3 * H])
            o = jax.nn.sigmoid(gates[:, 3 * H:4 * H])
            c = f * c + i * g
            h = o * jnp.tanh(c)
            outs.append(h)
        inp = jnp.stack(outs, axis=1)
    last = inp[:, T - 1]                                  # (B, H)
    logits = last @ params["lin_w"].T + params["lin_b"]
    return jax.nn.sigmoid(jnp.maximum(logits, 0.0))


if __name__ == "__main__":
    key = jax.random.PRNGKey(0)
    key, kx, kp = jax.random.split(key, 3)

    B, T = 2, 8
    x = jax.random.normal(kx, (B, T, N_MFCCS), jnp.float32)   # (batch, seq, n_mfccs)
    params = init_params(kp)

    out = gender_classifier_rnn(x, params)
    out = jax.block_until_ready(out)

    ref = reference_forward(x, params)
    np.testing.assert_allclose(np.asarray(out), np.asarray(ref), rtol=1e-4, atol=1e-4)

    print("KERNEL_OK")
</pallas_src>

<mosaic_0001>
module attributes {stable_mosaic.version = 11 : i64} {
  func.func @lstm_classifier_kernel(%arg0: memref<8x2x384xf32, #tpu.memory_space<vmem>>, %arg1: memref<96x384xf32, #tpu.memory_space<vmem>>, %arg2: memref<1x32xf32, #tpu.memory_space<vmem>>, %arg3: memref<1x1xf32, #tpu.memory_space<vmem>>, %arg4: memref<2x1xf32, #tpu.memory_space<vmem>>) attributes {dimension_semantics = [], scalar_prefetch = 0 : i64, scratch_operands = 0 : i64, tpu.core_type = #tpu.core_type<tc>} {
    %cst = arith.constant 0.000000e+00 : f32
    %0 = vector.broadcast %cst : f32 to vector<2x96xf32>
    %1 = tpu.iota {dimensions = array<i32: 1>} : vector<1x96xi32>
    %c0_i32 = arith.constant 0 : i32
    %2 = vector.broadcast %c0_i32 : i32 to vector<1x96xi32>
    %3 = arith.cmpi sge, %1, %2 : vector<1x96xi32>
    %c32_i32 = arith.constant 32 : i32
    %4 = vector.broadcast %c32_i32 : i32 to vector<1x96xi32>
    %5 = arith.cmpi slt, %1, %4 : vector<1x96xi32>
    %6 = arith.andi %3, %5 : vector<1x96xi1>
    %c0 = arith.constant 0 : index
    %c0_0 = arith.constant 0 : index
    %7 = vector.load %arg1[%c0, %c0_0] : memref<96x384xf32, #tpu.memory_space<vmem>>, vector<96x384xf32>
    %cst_1 = arith.constant dense<0.000000e+00> : vector<2x384xf32>
    %8 = tpu.matmul %0, %7, %cst_1 {dimension_numbers = #tpu.dot_dimension_numbers<[1], [0], [0], [1], [0, 0, 1, 1], [], []>} : vector<2x96xf32>, vector<96x384xf32>, vector<2x384xf32> -> vector<2x384xf32>
    %c0_2 = arith.constant 0 : index
    %c0_3 = arith.constant 0 : index
    %c0_4 = arith.constant 0 : index
    %9 = vector.load %arg0[%c0_2, %c0_3, %c0_4] : memref<8x2x384xf32, #tpu.memory_space<vmem>>, vector<1x2x384xf32>
    %10 = vector.shape_cast %9 : vector<1x2x384xf32> to vector<2x384xf32>
    %11 = arith.addf %8, %10 : vector<2x384xf32>
    %12 = arith.negf %11 : vector<2x384xf32>
    %13 = math.exp %12 : vector<2x384xf32>
    %cst_5 = arith.constant 1.000000e+00 : f32
    %14 = vector.broadcast %cst_5 : f32 to vector<2x384xf32>
    %15 = arith.addf %14, %13 : vector<2x384xf32>
    %16 = arith.divf %14, %15 : vector<2x384xf32>
    %17 = vector.extract_strided_slice %16 {offsets = [0, 0], sizes = [2, 96], strides = [1, 1]} : vector<2x384xf32> to vector<2x96xf32>
    %18 = vector.extract_strided_slice %16 {offsets = [0, 96], sizes = [2, 96], strides = [1, 1]} : vector<2x384xf32> to vector<2x96xf32>
    %19 = vector.extract_strided_slice %16 {offsets = [0, 192], sizes = [2, 96], strides = [1, 1]} : vector<2x384xf32> to vector<2x96xf32>
    %cst_6 = arith.constant 2.000000e+00 : f32
    %20 = vector.broadcast %cst_6 : f32 to vector<2x96xf32>
    %21 = arith.mulf %20, %19 : vector<2x96xf32>
    %cst_7 = arith.constant 1.000000e+00 : f32
    %22 = vector.broadcast %cst_7 : f32 to vector<2x96xf32>
    %23 = arith.subf %21, %22 : vector<2x96xf32>
    %24 = vector.extract_strided_slice %16 {offsets = [0, 288], sizes = [2, 96], strides = [1, 1]} : vector<2x384xf32> to vector<2x96xf32>
    %25 = arith.mulf %18, %0 : vector<2x96xf32>
    %26 = arith.mulf %17, %23 : vector<2x96xf32>
    %27 = arith.addf %25, %26 : vector<2x96xf32>
    %28 = math.tanh %27 : vector<2x96xf32>
    %29 = arith.mulf %24, %28 : vector<2x96xf32>
    %30 = vector.shape_cast %6 : vector<1x96xi1> to vector<1x96xi1>
    %31 = vector.broadcast %30 : vector<1x96xi1> to vector<2x96xi1>
    %32 = arith.select %31, %29, %0 : vector<2x96xi1>, vector<2x96xf32>
    %33 = vector.shape_cast %6 : vector<1x96xi1> to vector<1x96xi1>
    %34 = vector.broadcast %33 : vector<1x96xi1> to vector<2x96xi1>
    %35 = arith.select %34, %27, %0 : vector<2x96xi1>, vector<2x96xf32>
    %36 = tpu.iota {dimensions = array<i32: 1>} : vector<1x96xi32>
    %c0_i32_8 = arith.constant 0 : i32
    %37 = vector.broadcast %c0_i32_8 : i32 to vector<1x96xi32>
    %38 = arith.cmpi sge, %36, %37 : vector<1x96xi32>
    %c64_i32 = arith.constant 64 : i32
    %39 = vector.broadcast %c64_i32 : i32 to vector<1x96xi32>
    %40 = arith.cmpi slt, %36, %39 : vector<1x96xi32>
    %41 = arith.andi %38, %40 : vector<1x96xi1>
    %c0_9 = arith.constant 0 : index
    %c0_10 = arith.constant 0 : index
    %42 = vector.load %arg1[%c0_9, %c0_10] : memref<96x384xf32, #tpu.memory_space<vmem>>, vector<96x384xf32>
    %cst_11 = arith.constant dense<0.000000e+00> : vector<2x384xf32>
    %43 = tpu.matmul %32, %42, %cst_11 {dimension_numbers = #tpu.dot_dimension_numbers<[1], [0], [0], [1], [0, 0, 1, 1], [], []>} : vector<2x96xf32>, vector<96x384xf32>, vector<2x384xf32> -> vector<2x384xf32>
    %c1 = arith.constant 1 : index
    %c0_12 = arith.constant 0 : index
    %c0_13 = arith.constant 0 : index
    %44 = vector.load %arg0[%c1, %c0_12, %c0_13] : memref<8x2x384xf32, #tpu.memory_space<vmem>>, vector<1x2x384xf32>
    %45 = vector.shape_cast %44 : vector<1x2x384xf32> to vector<2x384xf32>
    %46 = arith.addf %43, %45 : vector<2x384xf32>
    %47 = arith.negf %46 : vector<2x384xf32>
    %48 = math.exp %47 : vector<2x384xf32>
    %cst_14 = arith.constant 1.000000e+00 : f32
    %49 = vector.broadcast %cst_14 : f32 to vector<2x384xf32>
    %50 = arith.addf %49, %48 : vector<2x384xf32>
    %51 = arith.divf %49, %50 : vector<2x384xf32>
    %52 = vector.extract_strided_slice %51 {offsets = [0, 0], sizes = [2, 96], strides = [1, 1]} : vector<2x384xf32> to vector<2x96xf32>
    %53 = vector.extract_strided_slice %51 {offsets = [0, 96], sizes = [2, 96], strides = [1, 1]} : vector<2x384xf32> to vector<2x96xf32>
    %54 = vector.extract_strided_slice %51 {offsets = [0, 192], sizes = [2, 96], strides = [1, 1]} : vector<2x384xf32> to vector<2x96xf32>
    %cst_15 = arith.constant 2.000000e+00 : f32
    %55 = vector.broadcast %cst_15 : f32 to vector<2x96xf32>
    %56 = arith.mulf %55, %54 : vector<2x96xf32>
    %cst_16 = arith.constant 1.000000e+00 : f32
    %57 = vector.broadcast %cst_16 : f32 to vector<2x96xf32>
    %58 = arith.subf %56, %57 : vector<2x96xf32>
    %59 = vector.extract_strided_slice %51 {offsets = [0, 288], sizes = [2, 96], strides = [1, 1]} : vector<2x384xf32> to vector<2x96xf32>
    %60 = arith.mulf %53, %35 : vector<2x96xf32>
    %61 = arith.mulf %52, %58 : vector<2x96xf32>
    %62 = arith.addf %60, %61 : vector<2x96xf32>
    %63 = math.tanh %62 : vector<2x96xf32>
    %64 = arith.mulf %59, %63 : vector<2x96xf32>
    %65 = vector.shape_cast %41 : vector<1x96xi1> to vector<1x96xi1>
    %66 = vector.broadcast %65 : vector<1x96xi1> to vector<2x96xi1>
    %67 = arith.select %66, %64, %32 : vector<2x96xi1>, vector<2x96xf32>
    %68 = vector.shape_cast %41 : vector<1x96xi1> to vector<1x96xi1>
    %69 = vector.broadcast %68 : vector<1x96xi1> to vector<2x96xi1>
    %70 = arith.select %69, %62, %35 : vector<2x96xi1>, vector<2x96xf32>
    %c2_i32 = arith.constant 2 : i32
    %c0_17 = arith.constant 0 : index
    %c0_18 = arith.constant 0 : index
    %71 = vector.load %arg1[%c0_17, %c0_18] : memref<96x384xf32, #tpu.memory_space<vmem>>, vector<96x384xf32>
    %cst_19 = arith.constant dense<0.000000e+00> : vector<2x384xf32>
    %72 = tpu.matmul %67, %71, %cst_19 {dimension_numbers = #tpu.dot_dimension_numbers<[1], [0], [0], [1], [0, 0, 1, 1], [], []>} : vector<2x96xf32>, vector<96x384xf32>, vector<2x384xf32> -> vector<2x384xf32>
    %73 = arith.index_cast %c2_i32 : i32 to index
    %c0_20 = arith.constant 0 : index
    %c0_21 = arith.constant 0 : index
    %74 = vector.load %arg0[%73, %c0_20, %c0_21] : memref<8x2x384xf32, #tpu.memory_space<vmem>>, vector<1x2x384xf32>
    %75 = vector.shape_cast %74 : vector<1x2x384xf32> to vector<2x384xf32>
    %76 = arith.addf %72, %75 : vector<2x384xf32>
    %77 = arith.negf %76 : vector<2x384xf32>
    %78 = math.exp %77 : vector<2x384xf32>
    %cst_22 = arith.constant 1.000000e+00 : f32
    %79 = vector.broadcast %cst_22 : f32 to vector<2x384xf32>
    %80 = arith.addf %79, %78 : vector<2x384xf32>
    %81 = arith.divf %79, %80 : vector<2x384xf32>
    %82 = vector.extract_strided_slice %81 {offsets = [0, 0], sizes = [2, 96], strides = [1, 1]} : vector<2x384xf32> to vector<2x96xf32>
    %83 = vector.extract_strided_slice %81 {offsets = [0, 96], sizes = [2, 96], strides = [1, 1]} : vector<2x384xf32> to vector<2x96xf32>
    %84 = vector.extract_strided_slice %81 {offsets = [0, 192], sizes = [2, 96], strides = [1, 1]} : vector<2x384xf32> to vector<2x96xf32>
    %cst_23 = arith.constant 2.000000e+00 : f32
    %85 = vector.broadcast %cst_23 : f32 to vector<2x96xf32>
    %86 = arith.mulf %85, %84 : vector<2x96xf32>
    %cst_24 = arith.constant 1.000000e+00 : f32
    %87 = vector.broadcast %cst_24 : f32 to vector<2x96xf32>
    %88 = arith.subf %86, %87 : vector<2x96xf32>
    %89 = vector.extract_strided_slice %81 {offsets = [0, 288], sizes = [2, 96], strides = [1, 1]} : vector<2x384xf32> to vector<2x96xf32>
    %90 = arith.mulf %83, %70 : vector<2x96xf32>
    %91 = arith.mulf %82, %88 : vector<2x96xf32>
    %92 = arith.addf %90, %91 : vector<2x96xf32>
    %93 = math.tanh %92 : vector<2x96xf32>
    %94 = arith.mulf %89, %93 : vector<2x96xf32>
    %c3_i32 = arith.constant 3 : i32
    %c0_25 = arith.constant 0 : index
    %c0_26 = arith.constant 0 : index
    %95 = vector.load %arg1[%c0_25, %c0_26] : memref<96x384xf32, #tpu.memory_space<vmem>>, vector<96x384xf32>
    %cst_27 = arith.constant dense<0.000000e+00> : vector<2x384xf32>
    %96 = tpu.matmul %94, %95, %cst_27 {dimension_numbers = #tpu.dot_dimension_numbers<[1], [0], [0], [1], [0, 0, 1, 1], [], []>} : vector<2x96xf32>, vector<96x384xf32>, vector<2x384xf32> -> vector<2x384xf32>
    %97 = arith.index_cast %c3_i32 : i32 to index
    %c0_28 = arith.constant 0 : index
    %c0_29 = arith.constant 0 : index
    %98 = vector.load %arg0[%97, %c0_28, %c0_29] : memref<8x2x384xf32, #tpu.memory_space<vmem>>, vector<1x2x384xf32>
    %99 = vector.shape_cast %98 : vector<1x2x384xf32> to vector<2x384xf32>
    %100 = arith.addf %96, %99 : vector<2x384xf32>
    %101 = arith.negf %100 : vector<2x384xf32>
    %102 = math.exp %101 : vector<2x384xf32>
    %cst_30 = arith.constant 1.000000e+00 : f32
    %103 = vector.broadcast %cst_30 : f32 to vector<2x384xf32>
    %104 = arith.addf %103, %102 : vector<2x384xf32>
    %105 = arith.divf %103, %104 : vector<2x384xf32>
    %106 = vector.extract_strided_slice %105 {offsets = [0, 0], sizes = [2, 96], strides = [1, 1]} : vector<2x384xf32> to vector<2x96xf32>
    %107 = vector.extract_strided_slice %105 {offsets = [0, 96], sizes = [2, 96], strides = [1, 1]} : vector<2x384xf32> to vector<2x96xf32>
    %108 = vector.extract_strided_slice %105 {offsets = [0, 192], sizes = [2, 96], strides = [1, 1]} : vector<2x384xf32> to vector<2x96xf32>
    %cst_31 = arith.constant 2.000000e+00 : f32
    %109 = vector.broadcast %cst_31 : f32 to vector<2x96xf32>
    %110 = arith.mulf %109, %108 : vector<2x96xf32>
    %cst_32 = arith.constant 1.000000e+00 : f32
    %111 = vector.broadcast %cst_32 : f32 to vector<2x96xf32>
    %112 = arith.subf %110, %111 : vector<2x96xf32>
    %113 = vector.extract_strided_slice %105 {offsets = [0, 288], sizes = [2, 96], strides = [1, 1]} : vector<2x384xf32> to vector<2x96xf32>
    %114 = arith.mulf %107, %92 : vector<2x96xf32>
    %115 = arith.mulf %106, %112 : vector<2x96xf32>
    %116 = arith.addf %114, %115 : vector<2x96xf32>
    %117 = math.tanh %116 : vector<2x96xf32>
    %118 = arith.mulf %113, %117 : vector<2x96xf32>
    %c4_i32 = arith.constant 4 : i32
    %c0_33 = arith.constant 0 : index
    %c0_34 = arith.constant 0 : index
    %119 = vector.load %arg1[%c0_33, %c0_34] : memref<96x384xf32, #tpu.memory_space<vmem>>, vector<96x384xf32>
    %cst_35 = arith.constant dense<0.000000e+00> : vector<2x384xf32>
    %120 = tpu.matmul %118, %119, %cst_35 {dimension_numbers = #tpu.dot_dimension_numbers<[1], [0], [0], [1], [0, 0, 1, 1], [], []>} : vector<2x96xf32>, vector<96x384xf32>, vector<2x384xf32> -> vector<2x384xf32>
    %121 = arith.index_cast %c4_i32 : i32 to index
    %c0_36 = arith.constant 0 : index
    %c0_37 = arith.constant 0 : index
    %122 = vector.load %arg0[%121, %c0_36, %c0_37] : memref<8x2x384xf32, #tpu.memory_space<vmem>>, vector<1x2x384xf32>
    %123 = vector.shape_cast %122 : vector<1x2x384xf32> to vector<2x384xf32>
    %124 = arith.addf %120, %123 : vector<2x384xf32>
    %125 = arith.negf %124 : vector<2x384xf32>
    %126 = math.exp %125 : vector<2x384xf32>
    %cst_38 = arith.constant 1.000000e+00 : f32
    %127 = vector.broadcast %cst_38 : f32 to vector<2x384xf32>
    %128 = arith.addf %127, %126 : vector<2x384xf32>
    %129 = arith.divf %127, %128 : vector<2x384xf32>
    %130 = vector.extract_strided_slice %129 {offsets = [0, 0], sizes = [2, 96], strides = [1, 1]} : vector<2x384xf32> to vector<2x96xf32>
    %131 = vector.extract_strided_slice %129 {offsets = [0, 96], sizes = [2, 96], strides = [1, 1]} : vector<2x384xf32> to vector<2x96xf32>
    %132 = vector.extract_strided_slice %129 {offsets = [0, 192], sizes = [2, 96], strides = [1, 1]} : vector<2x384xf32> to vector<2x96xf32>
    %cst_39 = arith.constant 2.000000e+00 : f32
    %133 = vector.broadcast %cst_39 : f32 to vector<2x96xf32>
    %134 = arith.mulf %133, %132 : vector<2x96xf32>
    %cst_40 = arith.constant 1.000000e+00 : f32
    %135 = vector.broadcast %cst_40 : f32 to vector<2x96xf32>
    %136 = arith.subf %134, %135 : vector<2x96xf32>
    %137 = vector.extract_strided_slice %129 {offsets = [0, 288], sizes = [2, 96], strides = [1, 1]} : vector<2x384xf32> to vector<2x96xf32>
    %138 = arith.mulf %131, %116 : vector<2x96xf32>
    %139 = arith.mulf %130, %136 : vector<2x96xf32>
    %140 = arith.addf %138, %139 : vector<2x96xf32>
    %141 = math.tanh %140 : vector<2x96xf32>
    %142 = arith.mulf %137, %141 : vector<2x96xf32>
    %c5_i32 = arith.constant 5 : i32
    %c0_41 = arith.constant 0 : index
    %c0_42 = arith.constant 0 : index
    %143 = vector.load %arg1[%c0_41, %c0_42] : memref<96x384xf32, #tpu.memory_space<vmem>>, vector<96x384xf32>
    %cst_43 = arith.constant dense<0.000000e+00> : vector<2x384xf32>
    %144 = tpu.matmul %142, %143, %cst_43 {dimension_numbers = #tpu.dot_dimension_numbers<[1], [0], [0], [1], [0, 0, 1, 1], [], []>} : vector<2x96xf32>, vector<96x384xf32>, vector<2x384xf32> -> vector<2x384xf32>
    %145 = arith.index_cast %c5_i32 : i32 to index
    %c0_44 = arith.constant 0 : index
    %c0_45 = arith.constant 0 : index
    %146 = vector.load %arg0[%145, %c0_44, %c0_45] : memref<8x2x384xf32, #tpu.memory_space<vmem>>, vector<1x2x384xf32>
    %147 = vector.shape_cast %146 : vector<1x2x384xf32> to vector<2x384xf32>
    %148 = arith.addf %144, %147 : vector<2x384xf32>
    %149 = arith.negf %148 : vector<2x384xf32>
    %150 = math.exp %149 : vector<2x384xf32>
    %cst_46 = arith.constant 1.000000e+00 : f32
    %151 = vector.broadcast %cst_46 : f32 to vector<2x384xf32>
    %152 = arith.addf %151, %150 : vector<2x384xf32>
    %153 = arith.divf %151, %152 : vector<2x384xf32>
    %154 = vector.extract_strided_slice %153 {offsets = [0, 0], sizes = [2, 96], strides = [1, 1]} : vector<2x384xf32> to vector<2x96xf32>
    %155 = vector.extract_strided_slice %153 {offsets = [0, 96], sizes = [2, 96], strides = [1, 1]} : vector<2x384xf32> to vector<2x96xf32>
    %156 = vector.extract_strided_slice %153 {offsets = [0, 192], sizes = [2, 96], strides = [1, 1]} : vector<2x384xf32> to vector<2x96xf32>
    %cst_47 = arith.constant 2.000000e+00 : f32
    %157 = vector.broadcast %cst_47 : f32 to vector<2x96xf32>
    %158 = arith.mulf %157, %156 : vector<2x96xf32>
    %cst_48 = arith.constant 1.000000e+00 : f32
    %159 = vector.broadcast %cst_48 : f32 to vector<2x96xf32>
    %160 = arith.subf %158, %159 : vector<2x96xf32>
    %161 = vector.extract_strided_slice %153 {offsets = [0, 288], sizes = [2, 96], strides = [1, 1]} : vector<2x384xf32> to vector<2x96xf32>
    %162 = arith.mulf %155, %140 : vector<2x96xf32>
    %163 = arith.mulf %154, %160 : vector<2x96xf32>
    %164 = arith.addf %162, %163 : vector<2x96xf32>
    %165 = math.tanh %164 : vector<2x96xf32>
    %166 = arith.mulf %161, %165 : vector<2x96xf32>
    %c6_i32 = arith.constant 6 : i32
    %c0_49 = arith.constant 0 : index
    %c0_50 = arith.constant 0 : index
    %167 = vector.load %arg1[%c0_49, %c0_50] : memref<96x384xf32, #tpu.memory_space<vmem>>, vector<96x384xf32>
    %cst_51 = arith.constant dense<0.000000e+00> : vector<2x384xf32>
    %168 = tpu.matmul %166, %167, %cst_51 {dimension_numbers = #tpu.dot_dimension_numbers<[1], [0], [0], [1], [0, 0, 1, 1], [], []>} : vector<2x96xf32>, vector<96x384xf32>, vector<2x384xf32> -> vector<2x384xf32>
    %169 = arith.index_cast %c6_i32 : i32 to index
    %c0_52 = arith.constant 0 : index
    %c0_53 = arith.constant 0 : index
    %170 = vector.load %arg0[%169, %c0_52, %c0_53] : memref<8x2x384xf32, #tpu.memory_space<vmem>>, vector<1x2x384xf32>
    %171 = vector.shape_cast %170 : vector<1x2x384xf32> to vector<2x384xf32>
    %172 = arith.addf %168, %171 : vector<2x384xf32>
    %173 = arith.negf %172 : vector<2x384xf32>
    %174 = math.exp %173 : vector<2x384xf32>
    %cst_54 = arith.constant 1.000000e+00 : f32
    %175 = vector.broadcast %cst_54 : f32 to vector<2x384xf32>
    %176 = arith.addf %175, %174 : vector<2x384xf32>
    %177 = arith.divf %175, %176 : vector<2x384xf32>
    %178 = vector.extract_strided_slice %177 {offsets = [0, 0], sizes = [2, 96], strides = [1, 1]} : vector<2x384xf32> to vector<2x96xf32>
    %179 = vector.extract_strided_slice %177 {offsets = [0, 96], sizes = [2, 96], strides = [1, 1]} : vector<2x384xf32> to vector<2x96xf32>
    %180 = vector.extract_strided_slice %177 {offsets = [0, 192], sizes = [2, 96], strides = [1, 1]} : vector<2x384xf32> to vector<2x96xf32>
    %cst_55 = arith.constant 2.000000e+00 : f32
    %181 = vector.broadcast %cst_55 : f32 to vector<2x96xf32>
    %182 = arith.mulf %181, %180 : vector<2x96xf32>
    %cst_56 = arith.constant 1.000000e+00 : f32
    %183 = vector.broadcast %cst_56 : f32 to vector<2x96xf32>
    %184 = arith.subf %182, %183 : vector<2x96xf32>
    %185 = vector.extract_strided_slice %177 {offsets = [0, 288], sizes = [2, 96], strides = [1, 1]} : vector<2x384xf32> to vector<2x96xf32>
    %186 = arith.mulf %179, %164 : vector<2x96xf32>
    %187 = arith.mulf %178, %184 : vector<2x96xf32>
    %188 = arith.addf %186, %187 : vector<2x96xf32>
    %189 = math.tanh %188 : vector<2x96xf32>
    %190 = arith.mulf %185, %189 : vector<2x96xf32>
    %c7_i32 = arith.constant 7 : i32
    %c0_57 = arith.constant 0 : index
    %c0_58 = arith.constant 0 : index
    %191 = vector.load %arg1[%c0_57, %c0_58] : memref<96x384xf32, #tpu.memory_space<vmem>>, vector<96x384xf32>
    %cst_59 = arith.constant dense<0.000000e+00> : vector<2x384xf32>
    %192 = tpu.matmul %190, %191, %cst_59 {dimension_numbers = #tpu.dot_dimension_numbers<[1], [0], [0], [1], [0, 0, 1, 1], [], []>} : vector<2x96xf32>, vector<96x384xf32>, vector<2x384xf32> -> vector<2x384xf32>
    %193 = arith.index_cast %c7_i32 : i32 to index
    %c0_60 = arith.constant 0 : index
    %c0_61 = arith.constant 0 : index
    %194 = vector.load %arg0[%193, %c0_60, %c0_61] : memref<8x2x384xf32, #tpu.memory_space<vmem>>, vector<1x2x384xf32>
    %195 = vector.shape_cast %194 : vector<1x2x384xf32> to vector<2x384xf32>
    %196 = arith.addf %192, %195 : vector<2x384xf32>
    %197 = arith.negf %196 : vector<2x384xf32>
    %198 = math.exp %197 : vector<2x384xf32>
    %cst_62 = arith.constant 1.000000e+00 : f32
    %199 = vector.broadcast %cst_62 : f32 to vector<2x384xf32>
    %200 = arith.addf %199, %198 : vector<2x384xf32>
    %201 = arith.divf %199, %200 : vector<2x384xf32>
    %202 = vector.extract_strided_slice %201 {offsets = [0, 0], sizes = [2, 96], strides = [1, 1]} : vector<2x384xf32> to vector<2x96xf32>
    %203 = vector.extract_strided_slice %201 {offsets = [0, 96], sizes = [2, 96], strides = [1, 1]} : vector<2x384xf32> to vector<2x96xf32>
    %204 = vector.extract_strided_slice %201 {offsets = [0, 192], sizes = [2, 96], strides = [1, 1]} : vector<2x384xf32> to vector<2x96xf32>
    %cst_63 = arith.constant 2.000000e+00 : f32
    %205 = vector.broadcast %cst_63 : f32 to vector<2x96xf32>
    %206 = arith.mulf %205, %204 : vector<2x96xf32>
    %cst_64 = arith.constant 1.000000e+00 : f32
    %207 = vector.broadcast %cst_64 : f32 to vector<2x96xf32>
    %208 = arith.subf %206, %207 : vector<2x96xf32>
    %209 = vector.extract_strided_slice %201 {offsets = [0, 288], sizes = [2, 96], strides = [1, 1]} : vector<2x384xf32> to vector<2x96xf32>
    %210 = arith.mulf %203, %188 : vector<2x96xf32>
    %211 = arith.mulf %202, %208 : vector<2x96xf32>
    %212 = arith.addf %210, %211 : vector<2x96xf32>
    %213 = math.tanh %212 : vector<2x96xf32>
    %214 = arith.mulf %209, %213 : vector<2x96xf32>
    %c6_i32_65 = arith.constant 6 : i32
    %215 = tpu.iota {dimensions = array<i32: 1>} : vector<1x96xi32>
    %c32_i32_66 = arith.constant 32 : i32
    %216 = vector.broadcast %c32_i32_66 : i32 to vector<1x96xi32>
    %217 = arith.cmpi sge, %215, %216 : vector<1x96xi32>
    %c96_i32 = arith.constant 96 : i32
    %218 = vector.broadcast %c96_i32 : i32 to vector<1x96xi32>
    %219 = arith.cmpi slt, %215, %218 : vector<1x96xi32>
    %220 = arith.andi %217, %219 : vector<1x96xi1>
    %c0_67 = arith.constant 0 : index
    %c0_68 = arith.constant 0 : index
    %221 = vector.load %arg1[%c0_67, %c0_68] : memref<96x384xf32, #tpu.memory_space<vmem>>, vector<96x384xf32>
    %cst_69 = arith.constant dense<0.000000e+00> : vector<2x384xf32>
    %222 = tpu.matmul %214, %221, %cst_69 {dimension_numbers = #tpu.dot_dimension_numbers<[1], [0], [0], [1], [0, 0, 1, 1], [], []>} : vector<2x96xf32>, vector<96x384xf32>, vector<2x384xf32> -> vector<2x384xf32>
    %c7 = arith.constant 7 : index
    %c0_70 = arith.constant 0 : index
    %c0_71 = arith.constant 0 : index
    %223 = vector.load %arg0[%c7, %c0_70, %c0_71] : memref<8x2x384xf32, #tpu.memory_space<vmem>>, vector<1x2x384xf32>
    %224 = vector.shape_cast %223 : vector<1x2x384xf32> to vector<2x384xf32>
    %225 = arith.addf %222, %224 : vector<2x384xf32>
    %226 = arith.negf %225 : vector<2x384xf32>
    %227 = math.exp %226 : vector<2x384xf32>
    %cst_72 = arith.constant 1.000000e+00 : f32
    %228 = vector.broadcast %cst_72 : f32 to vector<2x384xf32>
    %229 = arith.addf %228, %227 : vector<2x384xf32>
    %230 = arith.divf %228, %229 : vector<2x384xf32>
    %231 = vector.extract_strided_slice %230 {offsets = [0, 0], sizes = [2, 96], strides = [1, 1]} : vector<2x384xf32> to vector<2x96xf32>
    %232 = vector.extract_strided_slice %230 {offsets = [0, 96], sizes = [2, 96], strides = [1, 1]} : vector<2x384xf32> to vector<2x96xf32>
    %233 = vector.extract_strided_slice %230 {offsets = [0, 192], sizes = [2, 96], strides = [1, 1]} : vector<2x384xf32> to vector<2x96xf32>
    %cst_73 = arith.constant 2.000000e+00 : f32
    %234 = vector.broadcast %cst_73 : f32 to vector<2x96xf32>
    %235 = arith.mulf %234, %233 : vector<2x96xf32>
    %cst_74 = arith.constant 1.000000e+00 : f32
    %236 = vector.broadcast %cst_74 : f32 to vector<2x96xf32>
    %237 = arith.subf %235, %236 : vector<2x96xf32>
    %238 = vector.extract_strided_slice %230 {offsets = [0, 288], sizes = [2, 96], strides = [1, 1]} : vector<2x384xf32> to vector<2x96xf32>
    %239 = arith.mulf %232, %212 : vector<2x96xf32>
    %240 = arith.mulf %231, %237 : vector<2x96xf32>
    %241 = arith.addf %239, %240 : vector<2x96xf32>
    %242 = math.tanh %241 : vector<2x96xf32>
    %243 = arith.mulf %238, %242 : vector<2x96xf32>
    %244 = vector.shape_cast %220 : vector<1x96xi1> to vector<1x96xi1>
    %245 = vector.broadcast %244 : vector<1x96xi1> to vector<2x96xi1>
    %246 = arith.select %245, %243, %214 : vector<2x96xi1>, vector<2x96xf32>
    %247 = vector.shape_cast %220 : vector<1x96xi1> to vector<1x96xi1>
    %248 = vector.broadcast %247 : vector<1x96xi1> to vector<2x96xi1>
    %249 = arith.select %248, %241, %212 : vector<2x96xi1>, vector<2x96xf32>
    %250 = tpu.iota {dimensions = array<i32: 1>} : vector<1x96xi32>
    %c64_i32_75 = arith.constant 64 : i32
    %251 = vector.broadcast %c64_i32_75 : i32 to vector<1x96xi32>
    %252 = arith.cmpi sge, %250, %251 : vector<1x96xi32>
    %c96_i32_76 = arith.constant 96 : i32
    %253 = vector.broadcast %c96_i32_76 : i32 to vector<1x96xi32>
    %254 = arith.cmpi slt, %250, %253 : vector<1x96xi32>
    %255 = arith.andi %252, %254 : vector<1x96xi1>
    %c0_77 = arith.constant 0 : index
    %c0_78 = arith.constant 0 : index
    %256 = vector.load %arg1[%c0_77, %c0_78] : memref<96x384xf32, #tpu.memory_space<vmem>>, vector<96x384xf32>
    %cst_79 = arith.constant dense<0.000000e+00> : vector<2x384xf32>
    %257 = tpu.matmul %246, %256, %cst_79 {dimension_numbers = #tpu.dot_dimension_numbers<[1], [0], [0], [1], [0, 0, 1, 1], [], []>} : vector<2x96xf32>, vector<96x384xf32>, vector<2x384xf32> -> vector<2x384xf32>
    %c7_80 = arith.constant 7 : index
    %c0_81 = arith.constant 0 : index
    %c0_82 = arith.constant 0 : index
    %258 = vector.load %arg0[%c7_80, %c0_81, %c0_82] : memref<8x2x384xf32, #tpu.memory_space<vmem>>, vector<1x2x384xf32>
    %259 = vector.shape_cast %258 : vector<1x2x384xf32> to vector<2x384xf32>
    %260 = arith.addf %257, %259 : vector<2x384xf32>
    %261 = arith.negf %260 : vector<2x384xf32>
    %262 = math.exp %261 : vector<2x384xf32>
    %cst_83 = arith.constant 1.000000e+00 : f32
    %263 = vector.broadcast %cst_83 : f32 to vector<2x384xf32>
    %264 = arith.addf %263, %262 : vector<2x384xf32>
    %265 = arith.divf %263, %264 : vector<2x384xf32>
    %266 = vector.extract_strided_slice %265 {offsets = [0, 0], sizes = [2, 96], strides = [1, 1]} : vector<2x384xf32> to vector<2x96xf32>
    %267 = vector.extract_strided_slice %265 {offsets = [0, 96], sizes = [2, 96], strides = [1, 1]} : vector<2x384xf32> to vector<2x96xf32>
    %268 = vector.extract_strided_slice %265 {offsets = [0, 192], sizes = [2, 96], strides = [1, 1]} : vector<2x384xf32> to vector<2x96xf32>
    %cst_84 = arith.constant 2.000000e+00 : f32
    %269 = vector.broadcast %cst_84 : f32 to vector<2x96xf32>
    %270 = arith.mulf %269, %268 : vector<2x96xf32>
    %cst_85 = arith.constant 1.000000e+00 : f32
    %271 = vector.broadcast %cst_85 : f32 to vector<2x96xf32>
    %272 = arith.subf %270, %271 : vector<2x96xf32>
    %273 = vector.extract_strided_slice %265 {offsets = [0, 288], sizes = [2, 96], strides = [1, 1]} : vector<2x384xf32> to vector<2x96xf32>
    %274 = arith.mulf %267, %249 : vector<2x96xf32>
    %275 = arith.mulf %266, %272 : vector<2x96xf32>
    %276 = arith.addf %274, %275 : vector<2x96xf32>
    %277 = math.tanh %276 : vector<2x96xf32>
    %278 = arith.mulf %273, %277 : vector<2x96xf32>
    %279 = vector.shape_cast %255 : vector<1x96xi1> to vector<1x96xi1>
    %280 = vector.broadcast %279 : vector<1x96xi1> to vector<2x96xi1>
    %281 = arith.select %280, %278, %246 : vector<2x96xi1>, vector<2x96xf32>
    %282 = vector.extract_strided_slice %281 {offsets = [0, 64], sizes = [2, 32], strides = [1, 1]} : vector<2x96xf32> to vector<2x32xf32>
    %c0_86 = arith.constant 0 : index
    %c0_87 = arith.constant 0 : index
    %283 = vector.load %arg2[%c0_86, %c0_87] : memref<1x32xf32, #tpu.memory_space<vmem>>, vector<1x32xf32>
    %284 = vector.broadcast %283 : vector<1x32xf32> to vector<2x32xf32>
    %285 = arith.mulf %282, %284 : vector<2x32xf32>
    %cst_88 = arith.constant dense<0.000000e+00> : vector<2xf32>
    %286 = vector.multi_reduction <add>, %285, %cst_88 [1] : vector<2x32xf32> to vector<2xf32>
    %287 = vector.shape_cast %286 : vector<2xf32> to vector<2x1xf32>
    %c0_89 = arith.constant 0 : index
    %c0_90 = arith.constant 0 : index
    %288 = vector.load %arg3[%c0_89, %c0_90] : memref<1x1xf32, #tpu.memory_space<vmem>>, vector<1x1xf32>
    %289 = vector.broadcast %288 : vector<1x1xf32> to vector<2x1xf32>
    %290 = arith.addf %287, %289 : vector<2x1xf32>
    %cst_91 = arith.constant 0.000000e+00 : f32
    %291 = vector.broadcast %cst_91 : f32 to vector<2x1xf32>
    %292 = arith.maximumf %290, %291 : vector<2x1xf32>
    %293 = arith.negf %292 : vector<2x1xf32>
    %294 = math.exp %293 : vector<2x1xf32>
    %cst_92 = arith.constant 1.000000e+00 : f32
    %295 = vector.broadcast %cst_92 : f32 to vector<2x1xf32>
    %296 = arith.addf %295, %294 : vector<2x1xf32>
    %297 = arith.divf %295, %296 : vector<2x1xf32>
    %c0_93 = arith.constant 0 : index
    %c0_94 = arith.constant 0 : index
    %298 = vector.load %arg4[%c0_93, %c0_94] : memref<2x1xf32, #tpu.memory_space<vmem>>, vector<2x1xf32>
    tpu.vector_store %arg4[%c0_93, %c0_94], %297 {strides = array<i32>} : memref<2x1xf32, #tpu.memory_space<vmem>>, vector<2x1xf32>,
    return
  }
}

</mosaic_0001>

<bundles_post_ra>
// kernel: tpu_custom_call.1
= control target key start
LH: loop header
LB: loop body
LE: loop exit
PB: predicated region body
PF: predicated region fallthrough
CT: control target
= control target key end

     0   :  { %s2959_s0 = inlined_call_operand.hbm [shape: f32[8,2,384], index: 0, kind: input, shape index: {}]   ;;  %s2960_s1 = inlined_call_operand.hbm [shape: f32[96,384], index: 1, kind: input, shape index: {}]   ;;  %s2961_s2 = inlined_call_operand.vmem [shape: f32[1,32], index: 2, kind: input, shape index: {}]   ;;  %s2962_s3 = inlined_call_operand.<no memory space> [shape: f32[1,1], index: 3, kind: input, shape index: {}]   ;;  %s2963_s4 = inlined_call_operand.vmem [shape: f32[2,1], index: 4, kind: output, shape index: {}]  }
   0x1   :  { %v9_v0 = vstv %s2962_s3 }
   0x2   :  { %10 = vst [vmem:[#allocation2] sm:$0x1] %v9_v0 }
   0x3   :  { %11 = vsyncpa [#allocation4], 0  ;;  %s17_s19 = sshll.u32 %s2959_s0, 4  ;;  %s18_s19 = int_to_ptr.hbm [resolvable:$true] %s17_s19 }
   0x4   :  { %12 = vsyncpa [#allocation6], 0  ;;  %s2204_s20 = smov [#allocation3]   ;;  %s30_s24 = sshll.u32 %s2960_s1, 4  ;;  %s31_s24 = int_to_ptr.hbm [resolvable:$true] %s30_s24 }
   0x5   :  { %s19_s21 = sshll.u32 %s2204_s20, 4  ;;  %s2205_s25 = smov 96   ;;  %s20_s21 = int_to_ptr.vmem [resolvable:$true] %s19_s21 }
   0x6   :  { %s2206_s26 = smov 6   ;;  %s2207_s3 = smov [#allocation5]  }
   0x7   :  { %25 = dma.hbm_to_vmem [thread:$0]  %s18_s19, 768, %s20_s21, [#allocation4], %s2205_s25, %s2205_s25, %s2206_s26  }
   0x8   :  { %s32_s27 = sshll.u32 %s2207_s3, 4  ;;  %s2208_s28 = smov 384   ;;  %s33_s27 = int_to_ptr.vmem [resolvable:$true] %s32_s27 }
   0x9   :  { %s2209_s0 = smov 24  }
   0xa   :  { %38 = dma.hbm_to_vmem [thread:$0]  %s31_s24, 4608, %s33_s27, [#allocation6], %s2208_s28, %s2208_s28, %s2209_s0  }
   0xb   :  { %2200 = dma.done.wait [#allocation4], 768  }
   0xc   :  { %2201 = vsyncadd [#allocation4], 4294966528 }
   0xd   :  { %2202 = dma.done.wait [#allocation6], 4608  }
   0xe   :  { %2203 = vsyncadd [#allocation6], 4294962688  ;;  %v2249_v1 = vld [vmem:[#allocation5 + $0x110] sm:$0xff]  ;;  %v2251_v2 = vld [vmem:[#allocation5 + $0x118] sm:$0xff]  ;;  %v2210_v34 = vmov 0.0   ;;  %s2211_s1 = smov 64  }
   0xf   :  { %v2253_v3 = vld [vmem:[#allocation5 + $0xf8] sm:$0xff]  ;;  %129 = vmatpush.msra.mxu1 %v2249_v1  ;;  %149 = vmatpush.msra.mxu2 %v2251_v2  ;;  %v2257_v4 = vld [vmem:[#allocation5 + $0x100] sm:$0xff]  ;;  %v2261_v6 = vld [vmem:[#allocation5 + $0xe8] sm:$0xff]  ;;  %vm234_vm12 = vcmask 523264   ;;  %s2212_s29 = smov 32   ;;  %vm268_vm13 = vcmask 261120  }
  0x10   :  { %v2259_v5 = vld [vmem:[#allocation5 + $0xe0] sm:$0xff]  ;;  %v2265_v7 = vld [vmem:[#allocation5 + $0xc8] sm:$0xff]  ;;  %v2267_v8 = vld [vmem:[#allocation5 + $0xd0] sm:$0xff]  ;;  %vm101_vm15 = vcmask 785408  }
  0x11   :  { %130 = vmatpush.msra.mxu1 %v2253_v3  ;;  %150 = vmatpush.msra.mxu2 %v2257_v4  ;;  %v2271_v9 = vld [vmem:[#allocation5 + $0xb0] sm:$0xff]  ;;  %v2273_v10 = vld [vmem:[#allocation5 + $0xb8] sm:$0xff]  ;;  %v2279_v12 = vld [vmem:[#allocation5 + $0xa0] sm:$0xff] }
  0x12   :  { %v2277_v11 = vld [vmem:[#allocation5 + $0x98] sm:$0xff]  ;;  %v2281_v13 = vld [vmem:[#allocation5 + $0x108] sm:$0xff]  ;;  %v2285_v14 = vld [vmem:[#allocation5 + $0xf0] sm:$0xff] }
  0x13   :  { %131 = vmatpush.msra.mxu1 %v2259_v5  ;;  %151 = vmatpush.msra.mxu2 %v2261_v6  ;;  %v2287_v15 = vld [vmem:[#allocation5 + $0x80] sm:$0xff]  ;;  %v2289_v16 = vld [vmem:[#allocation5 + $0x88] sm:$0xff]  ;;  %v2297_v18 = vld [vmem:[#allocation5 + $0x70] sm:$0xff] }
  0x14   :  { %109 = vmatpush.msra.mxu0 %v2281_v13  ;;  %291 = vmatpush.msra.mxu3 %v2281_v13  ;;  %v2295_v17 = vld [vmem:[#allocation5 + $0x68] sm:$0xff]  ;;  %v2299_v19 = vld [vmem:[#allocation5 + $0xd8] sm:$0xff]  ;;  %v92_v20 = vld [vmem:[#allocation3] sm:$0x3f] }
  0x15   :  { %132 = vmatpush.msra.mxu1 %v2265_v7  ;;  %152 = vmatpush.msra.mxu2 %v2267_v8  ;;  %v2305_v21 = vld [vmem:[#allocation5 + $0xc0] sm:$0xff]  ;;  %94 = vst [vmem:[#allocation1] ss:$4 sm:$0xff] %v92_v20  ;;  %v2307_v22 = vld [vmem:[#allocation5 + $0x50] sm:$0xff]  ;;  %v2309_v23 = vld [vmem:[#allocation5 + $0x58] sm:$0xff] }
  0x16   :  { %110 = vmatpush.msra.mxu0 %v2285_v14  ;;  %292 = vmatpush.msra.mxu3 %v2285_v14  ;;  %v2315_v24 = vld [vmem:[#allocation5 + $0xa8] sm:$0xff]  ;;  %v2317_v25 = vld [vmem:[#allocation5 + $0x38] sm:$0xff]  ;;  %v2319_v26 = vld [vmem:[#allocation5 + $0x40] sm:$0xff] }
  0x17   :  { %133 = vmatpush.msra.mxu1 %v2271_v9  ;;  %153 = vmatpush.msra.mxu2 %v2273_v10  ;;  %v2325_v27 = vld [vmem:[#allocation5 + $0x90] sm:$0xff]  ;;  %v2327_v28 = vld [vmem:[#allocation5 + $0x20] sm:$0xff]  ;;  %v2329_v29 = vld [vmem:[#allocation5 + $0x28] sm:$0xff] }
  0x18   :  { %111 = vmatpush.msra.mxu0 %v2299_v19  ;;  %293 = vmatpush.msra.mxu3 %v2299_v19  ;;  %v2335_v30 = vld [vmem:[#allocation5 + $0x78] sm:$0xff]  ;;  %v2337_v31 = vld [vmem:[#allocation5 + $0x8] sm:$0xff]  ;;  %v2339_v32 = vld [vmem:[#allocation5 + $0x10] sm:$0xff] }
  0x19   :  { %134 = vmatpush.msra.mxu1 %v2277_v11  ;;  %154 = vmatpush.msra.mxu2 %v2279_v12  ;;  %v2346_v33 = vld [vmem:[#allocation5 + $0x60] sm:$0xff]  ;;  %v2351_v35 = vld [vmem:[#allocation5 + $0x48] sm:$0xff]  ;;  %v2355_v36 = vld [vmem:[#allocation5 + $0x30] sm:$0xff] }
  0x1a   :  { %112 = vmatpush.msra.mxu0 %v2305_v21  ;;  %294 = vmatpush.msra.mxu3 %v2305_v21  ;;  %v2361_v37 = vld [vmem:[#allocation5 + $0x18] sm:$0xff]  ;;  %v2367_v38 = vld [vmem:[#allocation5] sm:$0xff] }
  0x1b   :  { %135 = vmatpush.msra.mxu1 %v2287_v15  ;;  %155 = vmatpush.msra.mxu2 %v2289_v16  ;;  %v275_v49 = vld [vmem:[#allocation3 + $0x6] sm:$0x3f] }
  0x1c   :  { %113 = vmatpush.msra.mxu0 %v2315_v24  ;;  %295 = vmatpush.msra.mxu3 %v2315_v24  ;;  %v96_v39 = vld.sshfl [vmem:[#allocation1 + $0x8] sm:$0xff pattern:$0x73625140]  ;;  %v97_v43 = vld.sshfl [vmem:[#allocation1 + $0x10] sm:$0xff pattern:$0x73625140] }
  0x1d   :  { %136 = vmatpush.msra.mxu1 %v2295_v17  ;;  %156 = vmatpush.msra.mxu2 %v2297_v18  ;;  %v95_v48 = vld.sshfl [vmem:[#allocation1] sm:$0xff pattern:$0x73625140] }
  0x1e   :  { %114 = vmatpush.msra.mxu0 %v2325_v27  ;;  %296 = vmatpush.msra.mxu3 %v2325_v27  ;;  %277 = vst [vmem:[#allocation1] ss:$4 sm:$0xff] %v275_v49 }
  0x1f   :  { %137 = vmatpush.msra.mxu1 %v2307_v22  ;;  %157 = vmatpush.msra.mxu2 %v2309_v23 }
  0x20   :  { %115 = vmatpush.msra.mxu0 %v2335_v30  ;;  %297 = vmatpush.msra.mxu3 %v2335_v30 }
  0x21   :  { %138 = vmatpush.msra.mxu1 %v2317_v25  ;;  %158 = vmatpush.msra.mxu2 %v2319_v26 }
  0x22   :  { %116 = vmatpush.msra.mxu0 %v2346_v33  ;;  %298 = vmatpush.msra.mxu3 %v2346_v33 }
  0x23   :  { %139 = vmatpush.msra.mxu1 %v2327_v28  ;;  %159 = vmatpush.msra.mxu2 %v2329_v29 }
  0x24   :  { %117 = vmatpush.msra.mxu0 %v2351_v35  ;;  %299 = vmatpush.msra.mxu3 %v2351_v35 }
  0x25   :  { %140 = vmatpush.msra.mxu1 %v2337_v31  ;;  %160 = vmatpush.msra.mxu2 %v2339_v32 }
  0x26   :  { %141 = vmatmul.f32.vlgmr.msra.gmra.mxu1 %v2210_v34  ;;  %161 = vmatmul.f32.vlgmr.msra.gmra.mxu2 %v2210_v34 }
  0x27   :  { %331 = vmatpush.msrb.mxu1 %v2251_v2  ;;  %473 = vmatpush.msrb.mxu2 %v2281_v13 }
  0x28   :  { %118 = vmatpush.msra.mxu0 %v2355_v36  ;;  %300 = vmatpush.msra.mxu3 %v2355_v36 }
  0x29   :  { %332 = vmatpush.msrb.mxu1 %v2257_v4  ;;  %474 = vmatpush.msrb.mxu2 %v2285_v14 }
  0x2a   :  { %119 = vmatpush.msra.mxu0 %v2361_v37  ;;  %301 = vmatpush.msra.mxu3 %v2361_v37 }
  0x2b   :  { %333 = vmatpush.msrb.mxu1 %v2261_v6  ;;  %475 = vmatpush.msrb.mxu2 %v2299_v19 }
  0x2c   :  { %120 = vmatpush.msra.mxu0 %v2367_v38  ;;  %302 = vmatpush.msra.mxu3 %v2367_v38 }
  0x2d   :  { %334 = vmatpush.msrb.mxu1 %v2267_v8  ;;  %476 = vmatpush.msrb.mxu2 %v2305_v21 }
  0x2e   :  { %121 = vmatmul.f32.vlgmr.msra.gmra.mxu0 %v2210_v34  ;;  %493 = vmatpush.msrb.mxu3 %v2249_v1 }
  0x2f   :  { %335 = vmatpush.msrb.mxu1 %v2273_v10  ;;  %311 = vmatpush.msrb.mxu0 %v2249_v1 }
  0x30   :  { %477 = vmatpush.msrb.mxu2 %v2315_v24  ;;  %494 = vmatpush.msrb.mxu3 %v2253_v3 }
  0x31   :  { %336 = vmatpush.msrb.mxu1 %v2279_v12  ;;  %312 = vmatpush.msrb.mxu0 %v2253_v3 }
  0x32   :  { %478 = vmatpush.msrb.mxu2 %v2325_v27  ;;  %495 = vmatpush.msrb.mxu3 %v2259_v5 }
  0x33   :  { %337 = vmatpush.msrb.mxu1 %v2289_v16  ;;  %313 = vmatpush.msrb.mxu0 %v2259_v5 }
  0x34   :  { %479 = vmatpush.msrb.mxu2 %v2335_v30  ;;  %496 = vmatpush.msrb.mxu3 %v2265_v7 }
  0x35   :  { %338 = vmatpush.msrb.mxu1 %v2297_v18  ;;  %314 = vmatpush.msrb.mxu0 %v2265_v7 }
  0x36   :  { %480 = vmatpush.msrb.mxu2 %v2346_v33  ;;  %497 = vmatpush.msrb.mxu3 %v2271_v9 }
  0x37   :  { %339 = vmatpush.msrb.mxu1 %v2309_v23  ;;  %315 = vmatpush.msrb.mxu0 %v2271_v9 }
  0x38   :  { %481 = vmatpush.msrb.mxu2 %v2351_v35  ;;  %498 = vmatpush.msrb.mxu3 %v2277_v11 }
  0x39   :  { %340 = vmatpush.msrb.mxu1 %v2319_v26  ;;  %316 = vmatpush.msrb.mxu0 %v2277_v11 }
  0x3a   :  { %482 = vmatpush.msrb.mxu2 %v2355_v36  ;;  %499 = vmatpush.msrb.mxu3 %v2287_v15 }
  0x3b   :  { %341 = vmatpush.msrb.mxu1 %v2329_v29  ;;  %317 = vmatpush.msrb.mxu0 %v2287_v15 }
  0x3c   :  { %483 = vmatpush.msrb.mxu2 %v2361_v37  ;;  %500 = vmatpush.msrb.mxu3 %v2295_v17 }
  0x3d   :  { %342 = vmatpush.msrb.mxu1 %v2339_v32  ;;  %318 = vmatpush.msrb.mxu0 %v2295_v17 }
  0x3e   :  { %484 = vmatpush.msrb.mxu2 %v2367_v38  ;;  %501 = vmatpush.msrb.mxu3 %v2307_v22 }
  0x3f   :  { %641 = vmatpush.msra.mxu1 %v2281_v13  ;;  %319 = vmatpush.msrb.mxu0 %v2307_v22 }
  0x40   :  { %661 = vmatpush.msra.mxu2 %v2249_v1  ;;  %502 = vmatpush.msrb.mxu3 %v2317_v25 }
  0x41   :  { %642 = vmatpush.msra.mxu1 %v2285_v14  ;;  %320 = vmatpush.msrb.mxu0 %v2317_v25 }
  0x42   :  { %662 = vmatpush.msra.mxu2 %v2253_v3  ;;  %503 = vmatpush.msrb.mxu3 %v2327_v28 }
  0x43   :  { %643 = vmatpush.msra.mxu1 %v2299_v19  ;;  %321 = vmatpush.msrb.mxu0 %v2327_v28 }
  0x44   :  { %663 = vmatpush.msra.mxu2 %v2259_v5  ;;  %504 = vmatpush.msrb.mxu3 %v2337_v31 }
  0x45   :  { %644 = vmatpush.msra.mxu1 %v2305_v21  ;;  %322 = vmatpush.msrb.mxu0 %v2337_v31 }
  0x46   :  { %664 = vmatpush.msra.mxu2 %v2265_v7 }
  0x47   :  { %513 = vmatpush.msra.mxu0 %v2251_v2  ;;  %645 = vmatpush.msra.mxu1 %v2315_v24 }
  0x48   :  { %665 = vmatpush.msra.mxu2 %v2271_v9 }
  0x49   :  { %514 = vmatpush.msra.mxu0 %v2257_v4  ;;  %646 = vmatpush.msra.mxu1 %v2325_v27 }
  0x4a   :  { %666 = vmatpush.msra.mxu2 %v2277_v11 }
  0x4b   :  { %515 = vmatpush.msra.mxu0 %v2261_v6  ;;  %647 = vmatpush.msra.mxu1 %v2335_v30 }
  0x4c   :  { %667 = vmatpush.msra.mxu2 %v2287_v15 }
  0x4d   :  { %516 = vmatpush.msra.mxu0 %v2267_v8  ;;  %648 = vmatpush.msra.mxu1 %v2346_v33 }
  0x4e   :  { %668 = vmatpush.msra.mxu2 %v2295_v17 }
  0x4f   :  { %517 = vmatpush.msra.mxu0 %v2273_v10  ;;  %649 = vmatpush.msra.mxu1 %v2351_v35 }
  0x50   :  { %669 = vmatpush.msra.mxu2 %v2307_v22 }
  0x51   :  { %518 = vmatpush.msra.mxu0 %v2279_v12  ;;  %650 = vmatpush.msra.mxu1 %v2355_v36 }
  0x52   :  { %670 = vmatpush.msra.mxu2 %v2317_v25 }
  0x53   :  { %519 = vmatpush.msra.mxu0 %v2289_v16  ;;  %651 = vmatpush.msra.mxu1 %v2361_v37 }
  0x54   :  { %671 = vmatpush.msra.mxu2 %v2327_v28 }
  0x55   :  { %520 = vmatpush.msra.mxu0 %v2297_v18  ;;  %652 = vmatpush.msra.mxu1 %v2367_v38 }
  0x56   :  { %672 = vmatpush.msra.mxu2 %v2337_v31 }
  0x57   :  { %521 = vmatpush.msra.mxu0 %v2309_v23 }
  0x59   :  { %522 = vmatpush.msra.mxu0 %v2319_v26 }
  0x5b   :  { %523 = vmatpush.msra.mxu0 %v2329_v29 }
  0x5d   :  { %524 = vmatpush.msra.mxu0 %v2339_v32 }
  0xa3   :  { %v142_v40 = vpop.f32.mrf.mxu1 }
  0xa4   :  { %v143_v41 = vadd.f32 %v142_v40, %v96_v39 }
  0xa6   :  { %v1852_v42 = vmul.f32 -1.442695, %v143_v41 }
  0xa8   :  { %1940 = vpow2.f32 %v1852_v42 }
  0xa9   :  { %v162_v44 = vpop.f32.mrf.mxu2 }
  0xaa   :  { %v163_v45 = vadd.f32 %v162_v44, %v97_v43 }
  0xac   :  { %v1853_v46 = vmul.f32 -1.442695, %v163_v45 }
  0xae   :  { %v1941_v47 = vpop.eup %1940  ;;  %1942 = vpow2.f32 %v1853_v46 }
  0xaf   :  { %v175_v50 = vadd.f32 1.0, %v1941_v47 }
  0xb1   :  { %1944 = vrcp.f32 %v175_v50  ;;  %v203_v56 = vand.u32 2147483648, %v175_v50  ;;  %v201_v58 = vand.u32 2147483647, %v175_v50  ;;  %vm197_vm1 = vweird.f32 %v175_v50 }
  0xb3   :  { %v204_v62 = vor.u32 1.1754944e-38, %v203_v56  ;;  %vm202_vm3 = vcmp.eq.f32.partialorder %v201_v58, 8.507059e+37 }
  0xb4   :  { %v1943_v51 = vpop.eup %1942 }
  0xb5   :  { %v176_v52 = vadd.f32 1.0, %v1943_v51 }
  0xb7   :  { %v1945_v53 = vpop.eup %1944  ;;  %1946 = vrcp.f32 %v176_v52  ;;  %v218_v34 = vand.u32 2147483648, %v176_v52  ;;  %v216_v41 = vand.u32 2147483647, %v176_v52  ;;  %vm212_vm5 = vweird.f32 %v176_v52 }
  0xb8   :  { %v193_v54 = vmul.f32 %v1945_v53, %v175_v50  ;;  %vm198_vm0 = vweird.f32 %v1945_v53  ;;  %v122_v50 = vpop.f32.mrf.mxu0 }
  0xb9   :  { %vm199_vm2 = vmor %vm197_vm1, %vm198_vm0  ;;  %v219_v44 = vor.u32 1.1754944e-38, %v218_v34  ;;  %vm217_vm7 = vcmp.eq.f32.partialorder %v216_v41, 8.507059e+37  ;;  %v123_v51 = vadd.f32 %v122_v50, %v95_v48  ;;  %v51_v50 = vlaneseq }
  0xba   :  { %v194_v55 = vsub.f32 1.0, %v193_v54 }
  0xbc   :  { %v195_v57 = vmul.f32 %v1945_v53, %v194_v55 }
  0xbd   :  { %v1947_v59 = vpop.eup %1946 }
  0xbe   :  { %v208_v60 = vmul.f32 %v1947_v59, %v176_v52  ;;  %v196_v61 = vadd.f32 %v1945_v53, %v195_v57  ;;  %vm213_vm4 = vweird.f32 %v1947_v59 }
  0xbf   :  { %vm214_vm6 = vmor %vm212_vm5, %vm213_vm4 }
  0xc0   :  { %v200_v63 = vsel %vm199_vm2, %v1945_v53, %v196_v61  ;;  %v209_v0 = vsub.f32 1.0, %v208_v60  ;;  %v1851_v53 = vmul.f32 -1.442695, %v123_v51 }
  0xc1   :  { %v205_v20 = vsel %vm202_vm3, %v204_v62, %v200_v63 }
  0xc2   :  { %v222_v39 = vmul.f32 2.0, %v205_v20  ;;  %v210_v40 = vmul.f32 %v1947_v59, %v209_v0  ;;  %1948 = vpow2.f32 %v1851_v53 }
  0xc4   :  { %v1854_v42 = vadd.f32 -1.0, %v222_v39  ;;  %v211_v43 = vadd.f32 %v1947_v59, %v210_v40 }
  0xc6   :  { %230 = vrot.lane.b32.xlu0 %v1854_v42, %s2211_s1  ;;  %v215_v45 = vsel %vm214_vm6, %v1947_v59, %v211_v43  ;;  %v227_v42 = vmul.f32 0.0, %v205_v20 }
  0xc7   :  { %v220_v46 = vsel %vm217_vm7, %v219_v44, %v215_v45 }
  0xc8   :  { %v223_v47 = vmul.f32 2.0, %v220_v46  ;;  %v1949_v54 = vpop.eup %1948 }
  0xc9   :  { %v174_v55 = vadd.f32 1.0, %v1949_v54 }
  0xca   :  { %v1855_v49 = vadd.f32 -1.0, %v223_v47 }
  0xcb   :  { %1950 = vrcp.f32 %v174_v55  ;;  %vm182_vm8 = vweird.f32 %v174_v55  ;;  %v188_v59 = vand.u32 2147483648, %v174_v55  ;;  %v186_v62 = vand.u32 2147483647, %v174_v55 }
  0xcd   :  { %v189_v63 = vor.u32 1.1754944e-38, %v188_v59  ;;  %vm187_vm11 = vcmp.eq.f32.partialorder %v186_v62, 8.507059e+37  ;;  %v278_v62 = vld.sshfl [vmem:[#allocation1] sm:$0xff pattern:$0x73625140] }
  0xce   :  { %232 = vrot.lane.b32.xlu0 %v1855_v49, %s2211_s1 }
  0xd1   :  { %v1951_v52 = vpop.eup %1950 }
  0xd2   :  { %v178_v56 = vmul.f32 %v1951_v52, %v174_v55  ;;  %vm183_vm9 = vweird.f32 %v1951_v52  ;;  %v2462_v55 = vand.u32 127, %v51_v50 }
  0xd3   :  { %vm184_vm10 = vmor %vm182_vm8, %vm183_vm9 }
  0xd4   :  { %v179_v57 = vsub.f32 1.0, %v178_v56  ;;  %vm54_vm14 = vcmp.lt.s32.totalorder %v2462_v55, 32 }
  0xd6   :  { %v180_v58 = vmul.f32 %v1951_v52, %v179_v57 }
  0xd8   :  { %v181_v61 = vadd.f32 %v1951_v52, %v180_v58 }
  0xda   :  { %v185_v0 = vsel %vm184_vm10, %v1951_v52, %v181_v61  ;;  %v280_v61 = vld.sshfl [vmem:[#allocation1 + $0x10] sm:$0xff pattern:$0x73625140] }
  0xdb   :  { %v190_v34 = vsel %vm187_vm11, %v189_v63, %v185_v0  ;;  %v457_v63 = vld [vmem:[#allocation3 + $0xc] sm:$0x3f] }
  0xdc   :  { %v226_v41 = vmul.f32 0.0, %v190_v34 }
 0x138   :  { %v231_v60 = vpop.permute.xlu0 %230 }
 0x140   :  { %v233_v48 = vpop.permute.xlu0 %232 }
 0x141   :  { %v235_v39 = vsel %vm234_vm12, %v231_v60, %v233_v48 }
 0x142   :  { %v237_v40 = vmul.f32 %v235_v39, %v190_v34 }
 0x144   :  { %239 = vrot.lane.b32.xlu1 %v237_v40, %s2205_s25 }
 0x1b6   :  { %v240_v43 = vpop.permute.xlu1 %239 }
 0x1b7   :  { %v242_v44 = vadd.f32 %v240_v43, %v226_v41  ;;  %v243_v45 = vadd.f32 %v240_v43, %v227_v42 }
 0x1b9   :  { %1952 = vtanh.f32 %v242_v44  ;;  %264 = vrot.lane.b32.xlu0 %v242_v44, %s2212_s29 }
 0x1ba   :  { %1954 = vtanh.f32 %v243_v45 }
 0x1bf   :  { %v1953_v47 = vpop.eup %1952 }
 0x1c0   :  { %v1955_v49 = vpop.eup %1954  ;;  %248 = vrot.lane.b32.xlu1 %v1953_v47, %s2211_s1 }
 0x1c1   :  { %250 = vrot.lane.b32.xlu2 %v1955_v49, %s2211_s1 }
 0x1c8   :  { %266 = vrot.lane.b32.xlu1 %v243_v45, %s2212_s29 }
 0x21b   :  { %v251_v51 = vpop.permute.xlu2 %250 }
 0x22b   :  { %v265_v52 = vpop.permute.xlu0 %264 }
 0x232   :  { %v249_v53 = vpop.permute.xlu1 %248 }
 0x233   :  { %v252_v20 = vsel %vm234_vm12, %v249_v53, %v251_v51 }
 0x234   :  { %v254_v54 = vmul.f32 %v252_v20, %v220_v46  ;;  %v279_v46 = vld.sshfl [vmem:[#allocation1 + $0x8] sm:$0xff pattern:$0x73625140] }
 0x235   :  { %459 = vst [vmem:[#allocation1] ss:$4 sm:$0xff] %v457_v63 }
 0x236   :  { %258 = vrot.lane.b32.xlu2 %v254_v54, %s2205_s25 }
 0x23a   :  { %v267_v56 = vpop.permute.xlu1 %266 }
 0x23b   :  { %v269_v57 = vsel %vm268_vm13, %v265_v52, %v267_v56 }
 0x23c   :  { %v2467_v58 = vsel %vm54_vm14, %v269_v57, 0.0 }
 0x23d   :  { %409 = vrot.lane.b32.xlu1 %v2467_v58, %s2205_s25 }
 0x290   :  { %v259_v60 = vpop.permute.xlu2 %258 }
 0x291   :  { %v2471_v59 = vsel %vm54_vm14, %v259_v60, 0.0  ;;  %vm272_vm14 = vcmp.lt.s32.totalorder %v2462_v55, 64 }
 0x292   :  { %1856 = vmatmul.msk.f32.vlgmr.msra.gmra.mxu3 %vm101_vm15, %v2471_v59  ;;  %1857 = vmatmul.msk.f32.vlgmr.msrb.gmra.mxu0 %vm101_vm15, %v2471_v59 }
 0x293   :  { %1858 = vmatmul.msk.f32.vlgmr.msrb.gmra.mxu1 %vm101_vm15, %v2471_v59  ;;  %681 = vmatpush.msra.mxu3 %v2251_v2 }
 0x294   :  { %805 = vmatpush.msrb.mxu0 %v2281_v13  ;;  %825 = vmatpush.msrb.mxu1 %v2249_v1 }
 0x295   :  { %682 = vmatpush.msra.mxu3 %v2257_v4 }
 0x296   :  { %806 = vmatpush.msrb.mxu0 %v2285_v14  ;;  %826 = vmatpush.msrb.mxu1 %v2253_v3 }
 0x297   :  { %683 = vmatpush.msra.mxu3 %v2261_v6 }
 0x298   :  { %807 = vmatpush.msrb.mxu0 %v2299_v19  ;;  %827 = vmatpush.msrb.mxu1 %v2259_v5 }
 0x299   :  { %684 = vmatpush.msra.mxu3 %v2267_v8 }
 0x29a   :  { %808 = vmatpush.msrb.mxu0 %v2305_v21  ;;  %828 = vmatpush.msrb.mxu1 %v2265_v7 }
 0x29b   :  { %685 = vmatpush.msra.mxu3 %v2273_v10 }
 0x29c   :  { %809 = vmatpush.msrb.mxu0 %v2315_v24  ;;  %829 = vmatpush.msrb.mxu1 %v2271_v9 }
 0x29d   :  { %686 = vmatpush.msra.mxu3 %v2279_v12 }
 0x29e   :  { %810 = vmatpush.msrb.mxu0 %v2325_v27  ;;  %830 = vmatpush.msrb.mxu1 %v2277_v11 }
 0x29f   :  { %687 = vmatpush.msra.mxu3 %v2289_v16 }
 0x2a0   :  { %811 = vmatpush.msrb.mxu0 %v2335_v30  ;;  %831 = vmatpush.msrb.mxu1 %v2287_v15 }
 0x2a1   :  { %688 = vmatpush.msra.mxu3 %v2297_v18 }
 0x2a2   :  { %812 = vmatpush.msrb.mxu0 %v2346_v33  ;;  %832 = vmatpush.msrb.mxu1 %v2295_v17 }
 0x2a3   :  { %689 = vmatpush.msra.mxu3 %v2309_v23 }
 0x2a4   :  { %813 = vmatpush.msrb.mxu0 %v2351_v35  ;;  %833 = vmatpush.msrb.mxu1 %v2307_v22 }
 0x2a5   :  { %690 = vmatpush.msra.mxu3 %v2319_v26 }
 0x2a6   :  { %814 = vmatpush.msrb.mxu0 %v2355_v36  ;;  %834 = vmatpush.msrb.mxu1 %v2317_v25 }
 0x2a7   :  { %691 = vmatpush.msra.mxu3 %v2329_v29 }
 0x2a8   :  { %815 = vmatpush.msrb.mxu0 %v2361_v37  ;;  %835 = vmatpush.msrb.mxu1 %v2327_v28 }
 0x2a9   :  { %692 = vmatpush.msra.mxu3 %v2339_v32 }
 0x2aa   :  { %816 = vmatpush.msrb.mxu0 %v2367_v38  ;;  %836 = vmatpush.msrb.mxu1 %v2337_v31 }
 0x30f   :  { %v324_v0 = vpop.f32.mrf.mxu0 }
 0x310   :  { %v325_v48 = vadd.f32 %v324_v0, %v279_v46  ;;  %v344_v34 = vpop.f32.mrf.mxu1 }
 0x311   :  { %v345_v39 = vadd.f32 %v344_v34, %v280_v61 }
 0x312   :  { %v1860_v40 = vmul.f32 -1.442695, %v325_v48 }
 0x313   :  { %v1861_v41 = vmul.f32 -1.442695, %v345_v39 }
 0x314   :  { %1956 = vpow2.f32 %v1860_v40 }
 0x315   :  { %1958 = vpow2.f32 %v1861_v41 }
 0x31a   :  { %v1957_v42 = vpop.eup %1956 }
 0x31b   :  { %v1959_v43 = vpop.eup %1958  ;;  %v357_v44 = vadd.f32 1.0, %v1957_v42 }
 0x31c   :  { %v358_v45 = vadd.f32 1.0, %v1959_v43 }
 0x31d   :  { %1960 = vrcp.f32 %v357_v44  ;;  %v385_v54 = vand.u32 2147483648, %v357_v44  ;;  %v383_v57 = vand.u32 2147483647, %v357_v44  ;;  %vm379_vm2 = vweird.f32 %v357_v44 }
 0x31e   :  { %1962 = vrcp.f32 %v358_v45  ;;  %v400_v52 = vand.u32 2147483648, %v358_v45  ;;  %v398_v46 = vand.u32 2147483647, %v358_v45  ;;  %vm394_vm3 = vweird.f32 %v358_v45 }
 0x31f   :  { %v386_v0 = vor.u32 1.1754944e-38, %v385_v54  ;;  %vm384_vm6 = vcmp.eq.f32.partialorder %v383_v57, 8.507059e+37 }
 0x320   :  { %v401_v48 = vor.u32 1.1754944e-38, %v400_v52  ;;  %vm399_vm7 = vcmp.eq.f32.partialorder %v398_v46, 8.507059e+37 }
 0x323   :  { %v1961_v47 = vpop.eup %1960 }
 0x324   :  { %v1963_v49 = vpop.eup %1962  ;;  %v375_v50 = vmul.f32 %v1961_v47, %v357_v44  ;;  %vm380_vm0 = vweird.f32 %v1961_v47  ;;  %v304_v44 = vpop.f32.mrf.mxu3 }
 0x325   :  { %v390_v51 = vmul.f32 %v1963_v49, %v358_v45  ;;  %vm395_vm1 = vweird.f32 %v1963_v49  ;;  %vm381_vm4 = vmor %vm379_vm2, %vm380_vm0  ;;  %v305_v45 = vadd.f32 %v304_v44, %v278_v62 }
 0x326   :  { %v376_v53 = vsub.f32 1.0, %v375_v50  ;;  %vm396_vm5 = vmor %vm394_vm3, %vm395_vm1 }
 0x327   :  { %v391_v20 = vsub.f32 1.0, %v390_v51 }
 0x328   :  { %v377_v56 = vmul.f32 %v1961_v47, %v376_v53  ;;  %v1859_v53 = vmul.f32 -1.442695, %v305_v45 }
 0x329   :  { %v392_v60 = vmul.f32 %v1963_v49, %v391_v20 }
 0x32a   :  { %v378_v61 = vadd.f32 %v1961_v47, %v377_v56  ;;  %1964 = vpow2.f32 %v1859_v53 }
 0x32b   :  { %v393_v63 = vadd.f32 %v1963_v49, %v392_v60 }
 0x32c   :  { %v382_v34 = vsel %vm381_vm4, %v1961_v47, %v378_v61 }
 0x32d   :  { %v397_v39 = vsel %vm396_vm5, %v1963_v49, %v393_v63  ;;  %v387_v40 = vsel %vm384_vm6, %v386_v0, %v382_v34 }
 0x32e   :  { %v402_v41 = vsel %vm399_vm7, %v401_v48, %v397_v39  ;;  %v404_v42 = vmul.f32 2.0, %v387_v40 }
 0x32f   :  { %v405_v43 = vmul.f32 2.0, %v402_v41 }
 0x330   :  { %v1862_v50 = vadd.f32 -1.0, %v404_v42  ;;  %v1965_v20 = vpop.eup %1964  ;;  %v410_v42 = vpop.permute.xlu1 %409 }
 0x331   :  { %v1863_v51 = vadd.f32 -1.0, %v405_v43  ;;  %v356_v54 = vadd.f32 1.0, %v1965_v20 }
 0x332   :  { %416 = vrot.lane.b32.xlu2 %v1862_v50, %s2211_s1  ;;  %v413_v50 = vmul.f32 %v410_v42, %v387_v40 }
 0x333   :  { %418 = vrot.lane.b32.xlu0 %v1863_v51, %s2211_s1  ;;  %1966 = vrcp.f32 %v356_v54  ;;  %v370_v60 = vand.u32 2147483648, %v356_v54  ;;  %vm364_vm9 = vweird.f32 %v356_v54  ;;  %v368_v46 = vand.u32 2147483647, %v356_v54 }
 0x335   :  { %v371_v63 = vor.u32 1.1754944e-38, %v370_v60  ;;  %vm369_vm11 = vcmp.eq.f32.partialorder %v368_v46, 8.507059e+37 }
 0x339   :  { %v1967_v47 = vpop.eup %1966 }
 0x33a   :  { %v360_v49 = vmul.f32 %v1967_v47, %v356_v54  ;;  %vm365_vm8 = vweird.f32 %v1967_v47 }
 0x33b   :  { %vm366_vm10 = vmor %vm364_vm9, %vm365_vm8 }
 0x33c   :  { %v361_v52 = vsub.f32 1.0, %v360_v49 }
 0x33e   :  { %v362_v56 = vmul.f32 %v1967_v47, %v361_v52 }
 0x340   :  { %v363_v57 = vadd.f32 %v1967_v47, %v362_v56 }
 0x342   :  { %v367_v61 = vsel %vm366_vm10, %v1967_v47, %v363_v57 }
 0x343   :  { %v372_v34 = vsel %vm369_vm11, %v371_v63, %v367_v61 }
 0x344   :  { %v412_v43 = vmul.f32 %v410_v42, %v372_v34 }
 0x38c   :  { %v417_v0 = vpop.permute.xlu2 %416 }
 0x3a5   :  { %v419_v48 = vpop.permute.xlu0 %418 }
 0x3a6   :  { %v420_v62 = vsel %vm234_vm12, %v417_v0, %v419_v48 }
 0x3a7   :  { %v422_v39 = vmul.f32 %v420_v62, %v372_v34 }
 0x3a9   :  { %424 = vrot.lane.b32.xlu2 %v422_v39, %s2205_s25 }
 0x403   :  { %v425_v51 = vpop.permute.xlu2 %424 }
 0x404   :  { %v427_v44 = vadd.f32 %v425_v51, %v412_v43  ;;  %v428_v45 = vadd.f32 %v425_v51, %v413_v50 }
 0x406   :  { %1968 = vtanh.f32 %v427_v44 }
 0x407   :  { %1970 = vtanh.f32 %v428_v45 }
 0x40c   :  { %v1969_v53 = vpop.eup %1968 }
 0x40d   :  { %v1971_v20 = vpop.eup %1970  ;;  %433 = vrot.lane.b32.xlu0 %v1969_v53, %s2211_s1 }
 0x40e   :  { %435 = vrot.lane.b32.xlu1 %v1971_v20, %s2211_s1 }
 0x415   :  { %449 = vrot.lane.b32.xlu0 %v427_v44, %s2212_s29 }
 0x416   :  { %451 = vrot.lane.b32.xlu1 %v428_v45, %s2212_s29 }
 0x47f   :  { %v434_v54 = vpop.permute.xlu0 %433 }
 0x480   :  { %v436_v47 = vpop.permute.xlu1 %435 }
 0x481   :  { %v437_v49 = vsel %vm234_vm12, %v434_v54, %v436_v47 }
 0x482   :  { %v439_v40 = vmul.f32 %v437_v49, %v402_v41 }
 0x484   :  { %443 = vrot.lane.b32.xlu2 %v439_v40, %s2205_s25 }
 0x487   :  { %v450_v52 = vpop.permute.xlu0 %449 }
 0x488   :  { %v452_v56 = vpop.permute.xlu1 %451 }
 0x489   :  { %v453_v57 = vsel %vm268_vm13, %v450_v52, %v452_v56 }
 0x48a   :  { %v455_v60 = vsel %vm272_vm14, %v453_v57, %v2467_v58  ;;  %v460_v58 = vld.sshfl [vmem:[#allocation1] sm:$0xff pattern:$0x73625140] }
 0x48b   :  { %591 = vrot.lane.b32.xlu1 %v455_v60, %s2205_s25 }
 0x4de   :  { %v444_v46 = vpop.permute.xlu2 %443 }
 0x4df   :  { %v446_v61 = vsel %vm272_vm14, %v444_v46, %v2471_v59 }
 0x4e0   :  { %1864 = vmatmul.msk.f32.vlgmr.msrb.gmra.mxu2 %vm101_vm15, %v446_v61  ;;  %1865 = vmatmul.msk.f32.vlgmr.msrb.gmra.mxu3 %vm101_vm15, %v446_v61 }
 0x4e1   :  { %1866 = vmatmul.msk.f32.vlgmr.msra.gmra.mxu0 %vm101_vm15, %v446_v61  ;;  %845 = vmatpush.msrb.mxu2 %v2251_v2 }
 0x4e2   :  { %969 = vmatpush.msrb.mxu3 %v2281_v13  ;;  %989 = vmatpush.msra.mxu0 %v2249_v1  ;;  %v462_v1 = vld.sshfl [vmem:[#allocation1 + $0x10] sm:$0xff pattern:$0x73625140] }
 0x4e3   :  { %846 = vmatpush.msrb.mxu2 %v2257_v4 }
 0x4e4   :  { %970 = vmatpush.msrb.mxu3 %v2285_v14  ;;  %990 = vmatpush.msra.mxu0 %v2253_v3 }
 0x4e5   :  { %847 = vmatpush.msrb.mxu2 %v2261_v6 }
 0x4e6   :  { %971 = vmatpush.msrb.mxu3 %v2299_v19  ;;  %991 = vmatpush.msra.mxu0 %v2259_v5  ;;  %v461_v5 = vld.sshfl [vmem:[#allocation1 + $0x8] sm:$0xff pattern:$0x73625140] }
 0x4e7   :  { %848 = vmatpush.msrb.mxu2 %v2267_v8 }
 0x4e8   :  { %972 = vmatpush.msrb.mxu3 %v2305_v21  ;;  %992 = vmatpush.msra.mxu0 %v2265_v7 }
 0x4e9   :  { %849 = vmatpush.msrb.mxu2 %v2273_v10 }
 0x4ea   :  { %973 = vmatpush.msrb.mxu3 %v2315_v24  ;;  %993 = vmatpush.msra.mxu0 %v2271_v9 }
 0x4eb   :  { %850 = vmatpush.msrb.mxu2 %v2279_v12 }
 0x4ec   :  { %974 = vmatpush.msrb.mxu3 %v2325_v27  ;;  %994 = vmatpush.msra.mxu0 %v2277_v11 }
 0x4ed   :  { %851 = vmatpush.msrb.mxu2 %v2289_v16 }
 0x4ee   :  { %975 = vmatpush.msrb.mxu3 %v2335_v30  ;;  %995 = vmatpush.msra.mxu0 %v2287_v15 }
 0x4ef   :  { %852 = vmatpush.msrb.mxu2 %v2297_v18 }
 0x4f0   :  { %976 = vmatpush.msrb.mxu3 %v2346_v33  ;;  %996 = vmatpush.msra.mxu0 %v2295_v17 }
 0x4f1   :  { %853 = vmatpush.msrb.mxu2 %v2309_v23 }
 0x4f2   :  { %977 = vmatpush.msrb.mxu3 %v2351_v35  ;;  %997 = vmatpush.msra.mxu0 %v2307_v22 }
 0x4f3   :  { %854 = vmatpush.msrb.mxu2 %v2319_v26 }
 0x4f4   :  { %978 = vmatpush.msrb.mxu3 %v2355_v36  ;;  %998 = vmatpush.msra.mxu0 %v2317_v25 }
 0x4f5   :  { %855 = vmatpush.msrb.mxu2 %v2329_v29 }
 0x4f6   :  { %979 = vmatpush.msrb.mxu3 %v2361_v37  ;;  %999 = vmatpush.msra.mxu0 %v2327_v28 }
 0x4f7   :  { %856 = vmatpush.msrb.mxu2 %v2339_v32 }
 0x4f8   :  { %980 = vmatpush.msrb.mxu3 %v2367_v38  ;;  %1000 = vmatpush.msra.mxu0 %v2337_v31 }
 0x4fd   :  { %v592_v40 = vpop.permute.xlu1 %591 }
 0x55e   :  { %v526_v2 = vpop.f32.mrf.mxu0 }
 0x55f   :  { %v527_v3 = vadd.f32 %v526_v2, %v462_v1 }
 0x561   :  { %v1869_v4 = vmul.f32 -1.442695, %v527_v3 }
 0x563   :  { %1972 = vpow2.f32 %v1869_v4  ;;  %v506_v6 = vpop.f32.mrf.mxu3  ;;  %v486_v59 = vpop.f32.mrf.mxu2 }
 0x564   :  { %v507_v7 = vadd.f32 %v506_v6, %v461_v5  ;;  %v487_v41 = vadd.f32 %v486_v59, %v460_v58  ;;  %v623_v6 = vld [vmem:[#allocation3 + $0x12] sm:$0x3f]  ;;  %v2673_v58 = vld [vmem:[#allocation5 + $0x38] sm:$0xff]  ;;  %v2676_v59 = vld [vmem:[#allocation5 + $0x28] sm:$0xff] }
 0x565   :  { %628 = vst [vmem:[#allocation1] ss:$4 sm:$0xff] %v623_v6 }
 0x566   :  { %v1868_v8 = vmul.f32 -1.442695, %v507_v7  ;;  %v1867_v63 = vmul.f32 -1.442695, %v487_v41  ;;  %v2679_v41 = vld [vmem:[#allocation5 + $0x18] sm:$0xff] }
 0x568   :  { %1974 = vpow2.f32 %v1868_v8  ;;  %v2586_v8 = vld [vmem:[#allocation5 + $0x118] sm:$0xff] }
 0x569   :  { %v1973_v9 = vpop.eup %1972 }
 0x56a   :  { %v540_v10 = vadd.f32 1.0, %v1973_v9  ;;  %v2589_v9 = vld [vmem:[#allocation5 + $0x108] sm:$0xff] }
 0x56c   :  { %1976 = vrcp.f32 %v540_v10  ;;  %v582_v16 = vand.u32 2147483648, %v540_v10  ;;  %v580_v18 = vand.u32 2147483647, %v540_v10  ;;  %vm576_vm1 = vweird.f32 %v540_v10 }
 0x56e   :  { %v1975_v11 = vpop.eup %1974  ;;  %v583_v23 = vor.u32 1.1754944e-38, %v582_v16  ;;  %vm581_vm3 = vcmp.eq.f32.partialorder %v580_v18, 8.507059e+37  ;;  %v2610_v16 = vld [vmem:[#allocation5 + $0xe0] sm:$0xff] }
 0x56f   :  { %v539_v12 = vadd.f32 1.0, %v1975_v11  ;;  %v2595_v11 = vld [vmem:[#allocation5 + $0x100] sm:$0xff] }
 0x570   :  { %v2616_v18 = vld [vmem:[#allocation5 + $0xc0] sm:$0xff] }
 0x571   :  { %1978 = vrcp.f32 %v539_v12  ;;  %v567_v27 = vand.u32 2147483648, %v539_v12  ;;  %v565_v30 = vand.u32 2147483647, %v539_v12  ;;  %vm561_vm5 = vweird.f32 %v539_v12 }
 0x572   :  { %v1977_v13 = vpop.eup %1976  ;;  %1980 = vpow2.f32 %v1867_v63  ;;  %v2682_v63 = vld [vmem:[#allocation5 + $0x20] sm:$0xff] }
 0x573   :  { %v572_v14 = vmul.f32 %v1977_v13, %v540_v10  ;;  %vm577_vm0 = vweird.f32 %v1977_v13  ;;  %v568_v33 = vor.u32 1.1754944e-38, %v567_v27  ;;  %vm566_vm7 = vcmp.eq.f32.partialorder %v565_v30, 8.507059e+37  ;;  %v2592_v10 = vld [vmem:[#allocation5 + $0x110] sm:$0xff]  ;;  %v2640_v27 = vld [vmem:[#allocation5 + $0x88] sm:$0xff] }
 0x574   :  { %vm578_vm2 = vmor %vm576_vm1, %vm577_vm0  ;;  %v2649_v30 = vld [vmem:[#allocation5 + $0x70] sm:$0xff] }
 0x575   :  { %v573_v15 = vsub.f32 1.0, %v572_v14  ;;  %v2604_v14 = vld [vmem:[#allocation5 + $0xe8] sm:$0xff] }
 0x577   :  { %v574_v17 = vmul.f32 %v1977_v13, %v573_v15  ;;  %v1979_v19 = vpop.eup %1978  ;;  %v2607_v15 = vld [vmem:[#allocation5 + $0xd8] sm:$0xff] }
 0x578   :  { %v557_v21 = vmul.f32 %v1979_v19, %v539_v12  ;;  %vm562_vm4 = vweird.f32 %v1979_v19  ;;  %v1981_v0 = vpop.eup %1980  ;;  %v2598_v12 = vld [vmem:[#allocation5 + $0xf0] sm:$0xff] }
 0x579   :  { %v575_v22 = vadd.f32 %v1977_v13, %v574_v17  ;;  %vm563_vm6 = vmor %vm561_vm5, %vm562_vm4  ;;  %v538_v48 = vadd.f32 1.0, %v1981_v0  ;;  %v2613_v17 = vld [vmem:[#allocation5 + $0xd0] sm:$0xff] }
 0x57a   :  { %v558_v25 = vsub.f32 1.0, %v557_v21  ;;  %v2622_v21 = vld [vmem:[#allocation5 + $0xb8] sm:$0xff]  ;;  %v2685_v0 = vld [vmem:[#allocation5 + $0x10] sm:$0xff] }
 0x57b   :  { %v579_v24 = vsel %vm578_vm2, %v1977_v13, %v575_v22  ;;  %1982 = vrcp.f32 %v538_v48  ;;  %v552_v50 = vand.u32 2147483648, %v538_v48  ;;  %vm546_vm9 = vweird.f32 %v538_v48  ;;  %v2601_v13 = vld [vmem:[#allocation5 + $0xf8] sm:$0xff]  ;;  %v2625_v22 = vld [vmem:[#allocation5 + $0xa8] sm:$0xff] }
 0x57c   :  { %v584_v26 = vsel %vm581_vm3, %v583_v23, %v579_v24  ;;  %v559_v29 = vmul.f32 %v1979_v19, %v558_v25  ;;  %v550_v51 = vand.u32 2147483647, %v538_v48  ;;  %v2628_v23 = vld [vmem:[#allocation5 + $0xb0] sm:$0xff]  ;;  %v2631_v24 = vld [vmem:[#allocation5 + $0xa0] sm:$0xff] }
 0x57d   :  { %v587_v28 = vmul.f32 2.0, %v584_v26  ;;  %v553_v45 = vor.u32 1.1754944e-38, %v552_v50  ;;  %v2634_v25 = vld [vmem:[#allocation5 + $0x90] sm:$0xff] }
 0x57e   :  { %v560_v32 = vadd.f32 %v1979_v19, %v559_v29  ;;  %vm551_vm11 = vcmp.eq.f32.partialorder %v550_v51, 8.507059e+37  ;;  %v2646_v29 = vld [vmem:[#allocation5 + $0x80] sm:$0xff] }
 0x57f   :  { %v1871_v31 = vadd.f32 -1.0, %v587_v28  ;;  %v2643_v28 = vld [vmem:[#allocation5 + $0x78] sm:$0xff] }
 0x580   :  { %v564_v35 = vsel %vm563_vm6, %v1979_v19, %v560_v32  ;;  %v2619_v19 = vld [vmem:[#allocation5 + $0xc8] sm:$0xff] }
 0x581   :  { %600 = vrot.lane.b32.xlu0 %v1871_v31, %s2211_s1  ;;  %v569_v36 = vsel %vm566_vm7, %v568_v33, %v564_v35  ;;  %v1983_v62 = vpop.eup %1982  ;;  %v2652_v31 = vld [vmem:[#allocation5 + $0x60] sm:$0xff]  ;;  %v2655_v32 = vld [vmem:[#allocation5 + $0x68] sm:$0xff]  ;;  %v2658_v33 = vld [vmem:[#allocation5 + $0x58] sm:$0xff] }
 0x582   :  { %v586_v37 = vmul.f32 2.0, %v569_v36  ;;  %v542_v34 = vmul.f32 %v1983_v62, %v538_v48  ;;  %vm547_vm8 = vweird.f32 %v1983_v62  ;;  %v595_v56 = vmul.f32 %v592_v40, %v569_v36  ;;  %v2661_v35 = vld [vmem:[#allocation5 + $0x48] sm:$0xff]  ;;  %v2664_v36 = vld [vmem:[#allocation5 + $0x50] sm:$0xff]  ;;  %v2688_v48 = vld [vmem:[#allocation5] sm:$0xff] }
 0x583   :  { %vm548_vm10 = vmor %vm546_vm9, %vm547_vm8 }
 0x584   :  { %v1870_v38 = vadd.f32 -1.0, %v586_v37  ;;  %v543_v39 = vsub.f32 1.0, %v542_v34  ;;  %v2667_v37 = vld [vmem:[#allocation5 + $0x40] sm:$0xff]  ;;  %v630_v34 = vld.sshfl [vmem:[#allocation1 + $0x8] sm:$0xff pattern:$0x73625140] }
 0x586   :  { %598 = vrot.lane.b32.xlu2 %v1870_v38, %s2211_s1  ;;  %v544_v42 = vmul.f32 %v1983_v62, %v543_v39  ;;  %v2670_v38 = vld [vmem:[#allocation5 + $0x30] sm:$0xff] }
 0x587   :  { %v631_v39 = vld.sshfl [vmem:[#allocation1 + $0x10] sm:$0xff pattern:$0x73625140] }
 0x588   :  { %v545_v43 = vadd.f32 %v1983_v62, %v544_v42 }
 0x58a   :  { %v549_v44 = vsel %vm548_vm10, %v1983_v62, %v545_v43  ;;  %v2691_v62 = vld [vmem:[#allocation5 + $0x8] sm:$0xff] }
 0x58b   :  { %v554_v47 = vsel %vm551_vm11, %v553_v45, %v549_v44 }
 0x58c   :  { %v594_v52 = vmul.f32 %v592_v40, %v554_v47 }
 0x5e0   :  { %v599_v53 = vpop.permute.xlu2 %598 }
 0x5f3   :  { %v601_v20 = vpop.permute.xlu0 %600 }
 0x5f4   :  { %v602_v54 = vsel %vm234_vm12, %v599_v53, %v601_v20 }
 0x5f5   :  { %v604_v49 = vmul.f32 %v602_v54, %v554_v47 }
 0x5f7   :  { %606 = vrot.lane.b32.xlu2 %v604_v49, %s2205_s25 }
 0x651   :  { %v607_v57 = vpop.permute.xlu2 %606 }
 0x652   :  { %v2573_v60 = vadd.f32 %v607_v57, %v594_v52  ;;  %v2575_v46 = vadd.f32 %v607_v57, %v595_v56 }
 0x654   :  { %1984 = vtanh.f32 %v2573_v60 }
 0x655   :  { %1986 = vtanh.f32 %v2575_v46 }
 0x65a   :  { %v1985_v61 = vpop.eup %1984 }
 0x65b   :  { %v1987_v1 = vpop.eup %1986  ;;  %615 = vrot.lane.b32.xlu0 %v1985_v61, %s2211_s1 }
 0x65c   :  { %617 = vrot.lane.b32.xlu1 %v1987_v1, %s2211_s1 }
 0x6cd   :  { %v616_v2 = vpop.permute.xlu0 %615 }
 0x6ce   :  { %v618_v3 = vpop.permute.xlu1 %617 }
 0x6cf   :  { %v619_v4 = vsel %vm234_vm12, %v616_v2, %v618_v3 }
 0x6d0   :  { %v621_v5 = vmul.f32 %v619_v4, %v584_v26  ;;  %v2637_v26 = vld [vmem:[#allocation5 + $0x98] sm:$0xff] }
 0x6d2   :  { %625 = vrot.lane.b32.xlu2 %v621_v5, %s2205_s25 }
 0x72c   :  { %v626_v7 = vpop.permute.xlu2 %625 }
 0x72d   :  { %1872 = vmatmul.msk.f32.vlgmr.msra.gmra.mxu1 %vm101_vm15, %v626_v7  ;;  %1873 = vmatmul.msk.f32.vlgmr.msra.gmra.mxu2 %vm101_vm15, %v626_v7 }
 0x72e   :  { %1874 = vmatmul.msk.f32.vlgmr.msra.gmra.mxu3 %vm101_vm15, %v626_v7  ;;  %1009 = vmatpush.msra.mxu1 %v2586_v8 }
 0x72f   :  { %1133 = vmatpush.msra.mxu2 %v2589_v9  ;;  %1153 = vmatpush.msra.mxu3 %v2592_v10 }
 0x730   :  { %1010 = vmatpush.msra.mxu1 %v2595_v11 }
 0x731   :  { %1134 = vmatpush.msra.mxu2 %v2598_v12  ;;  %1154 = vmatpush.msra.mxu3 %v2601_v13 }
 0x732   :  { %1011 = vmatpush.msra.mxu1 %v2604_v14 }
 0x733   :  { %1135 = vmatpush.msra.mxu2 %v2607_v15  ;;  %1155 = vmatpush.msra.mxu3 %v2610_v16 }
 0x734   :  { %1012 = vmatpush.msra.mxu1 %v2613_v17 }
 0x735   :  { %1136 = vmatpush.msra.mxu2 %v2616_v18  ;;  %1156 = vmatpush.msra.mxu3 %v2619_v19 }
 0x736   :  { %1013 = vmatpush.msra.mxu1 %v2622_v21 }
 0x737   :  { %1137 = vmatpush.msra.mxu2 %v2625_v22  ;;  %1157 = vmatpush.msra.mxu3 %v2628_v23 }
 0x738   :  { %1014 = vmatpush.msra.mxu1 %v2631_v24 }
 0x739   :  { %1138 = vmatpush.msra.mxu2 %v2634_v25  ;;  %1158 = vmatpush.msra.mxu3 %v2637_v26 }
 0x73a   :  { %1015 = vmatpush.msra.mxu1 %v2640_v27 }
 0x73b   :  { %1139 = vmatpush.msra.mxu2 %v2643_v28  ;;  %1159 = vmatpush.msra.mxu3 %v2646_v29 }
 0x73c   :  { %1016 = vmatpush.msra.mxu1 %v2649_v30 }
 0x73d   :  { %1140 = vmatpush.msra.mxu2 %v2652_v31  ;;  %1160 = vmatpush.msra.mxu3 %v2655_v32 }
 0x73e   :  { %1017 = vmatpush.msra.mxu1 %v2658_v33 }
 0x73f   :  { %1141 = vmatpush.msra.mxu2 %v2661_v35  ;;  %1161 = vmatpush.msra.mxu3 %v2664_v36 }
 0x740   :  { %1018 = vmatpush.msra.mxu1 %v2667_v37 }
 0x741   :  { %1142 = vmatpush.msra.mxu2 %v2670_v38  ;;  %1162 = vmatpush.msra.mxu3 %v2673_v58 }
 0x742   :  { %1019 = vmatpush.msra.mxu1 %v2676_v59 }
 0x743   :  { %1143 = vmatpush.msra.mxu2 %v2679_v41  ;;  %1163 = vmatpush.msra.mxu3 %v2682_v63 }
 0x744   :  { %1020 = vmatpush.msra.mxu1 %v2685_v0 }
 0x745   :  { %1144 = vmatpush.msra.mxu2 %v2688_v48  ;;  %1164 = vmatpush.msra.mxu3 %v2691_v62 }
 0x7b0   :  { %v674_v42 = vpop.f32.mrf.mxu2 }
 0x7b1   :  { %v675_v43 = vadd.f32 %v674_v42, %v630_v34  ;;  %v694_v50 = vpop.f32.mrf.mxu3 }
 0x7b2   :  { %v695_v51 = vadd.f32 %v694_v50, %v631_v39 }
 0x7b3   :  { %v1876_v44 = vmul.f32 -1.442695, %v675_v43 }
 0x7b4   :  { %v1877_v45 = vmul.f32 -1.442695, %v695_v51 }
 0x7b5   :  { %1988 = vpow2.f32 %v1876_v44 }
 0x7b6   :  { %1990 = vpow2.f32 %v1877_v45 }
 0x7bb   :  { %v1989_v53 = vpop.eup %1988 }
 0x7bc   :  { %v1991_v20 = vpop.eup %1990  ;;  %v707_v54 = vadd.f32 1.0, %v1989_v53 }
 0x7bd   :  { %v708_v47 = vadd.f32 1.0, %v1991_v20 }
 0x7be   :  { %1992 = vrcp.f32 %v707_v54  ;;  %v735_v1 = vand.u32 2147483648, %v707_v54  ;;  %v733_v4 = vand.u32 2147483647, %v707_v54  ;;  %vm729_vm1 = vweird.f32 %v707_v54 }
 0x7bf   :  { %1994 = vrcp.f32 %v708_v47  ;;  %v750_v2 = vand.u32 2147483648, %v708_v47  ;;  %v748_v6 = vand.u32 2147483647, %v708_v47  ;;  %vm744_vm2 = vweird.f32 %v708_v47 }
 0x7c0   :  { %v736_v39 = vor.u32 1.1754944e-38, %v735_v1  ;;  %vm734_vm5 = vcmp.eq.f32.partialorder %v733_v4, 8.507059e+37 }
 0x7c1   :  { %v751_v42 = vor.u32 1.1754944e-38, %v750_v2  ;;  %vm749_vm6 = vcmp.eq.f32.partialorder %v748_v6, 8.507059e+37 }
 0x7c4   :  { %v1993_v49 = vpop.eup %1992 }
 0x7c5   :  { %v1995_v40 = vpop.eup %1994  ;;  %v725_v52 = vmul.f32 %v1993_v49, %v707_v54  ;;  %vm730_vm14 = vweird.f32 %v1993_v49  ;;  %v629_v54 = vld.sshfl [vmem:[#allocation1] sm:$0xff pattern:$0x73625140] }
 0x7c6   :  { %v740_v56 = vmul.f32 %v1995_v40, %v708_v47  ;;  %vm745_vm0 = vweird.f32 %v1995_v40  ;;  %vm731_vm3 = vmor %vm729_vm1, %vm730_vm14  ;;  %v654_v47 = vpop.f32.mrf.mxu1 }
 0x7c7   :  { %v726_v57 = vsub.f32 1.0, %v725_v52  ;;  %vm746_vm4 = vmor %vm744_vm2, %vm745_vm0 }
 0x7c8   :  { %v741_v61 = vsub.f32 1.0, %v740_v56  ;;  %v655_v56 = vadd.f32 %v654_v47, %v629_v54 }
 0x7c9   :  { %v727_v3 = vmul.f32 %v1993_v49, %v726_v57 }
 0x7ca   :  { %v742_v5 = vmul.f32 %v1995_v40, %v741_v61  ;;  %v1875_v57 = vmul.f32 -1.442695, %v655_v56 }
 0x7cb   :  { %v728_v7 = vadd.f32 %v1993_v49, %v727_v3 }
 0x7cc   :  { %v743_v34 = vadd.f32 %v1995_v40, %v742_v5  ;;  %1996 = vpow2.f32 %v1875_v57 }
 0x7cd   :  { %v732_v43 = vsel %vm731_vm3, %v1993_v49, %v728_v7 }
 0x7ce   :  { %v747_v50 = vsel %vm746_vm4, %v1995_v40, %v743_v34  ;;  %v737_v51 = vsel %vm734_vm5, %v736_v39, %v732_v43 }
 0x7cf   :  { %v752_v44 = vsel %vm749_vm6, %v751_v42, %v747_v50  ;;  %v754_v45 = vmul.f32 2.0, %v737_v51 }
 0x7d0   :  { %v755_v53 = vmul.f32 2.0, %v752_v44 }
 0x7d1   :  { %v1878_v20 = vadd.f32 -1.0, %v754_v45 }
 0x7d2   :  { %v1879_v52 = vadd.f32 -1.0, %v755_v53  ;;  %v1997_v61 = vpop.eup %1996 }
 0x7d3   :  { %762 = vrot.lane.b32.xlu0 %v1878_v20, %s2211_s1  ;;  %v706_v49 = vadd.f32 1.0, %v1997_v61  ;;  %v759_v20 = vmul.f32 %v737_v51, %v2575_v46  ;;  %v787_v51 = vld [vmem:[#allocation3 + $0x18] sm:$0x3f] }
 0x7d4   :  { %764 = vrot.lane.b32.xlu1 %v1879_v52, %s2211_s1  ;;  %792 = vst [vmem:[#allocation1] ss:$4 sm:$0xff] %v787_v51 }
 0x7d5   :  { %1998 = vrcp.f32 %v706_v49  ;;  %v720_v5 = vand.u32 2147483648, %v706_v49  ;;  %vm714_vm8 = vweird.f32 %v706_v49  ;;  %v718_v6 = vand.u32 2147483647, %v706_v49 }
 0x7d7   :  { %v721_v39 = vor.u32 1.1754944e-38, %v720_v5  ;;  %vm719_vm10 = vcmp.eq.f32.partialorder %v718_v6, 8.507059e+37 }
 0x7db   :  { %v1999_v40 = vpop.eup %1998 }
 0x7dc   :  { %v710_v1 = vmul.f32 %v1999_v40, %v706_v49  ;;  %vm715_vm7 = vweird.f32 %v1999_v40 }
 0x7dd   :  { %vm716_vm9 = vmor %vm714_vm8, %vm715_vm7 }
 0x7de   :  { %v711_v2 = vsub.f32 1.0, %v710_v1 }
 0x7e0   :  { %v712_v3 = vmul.f32 %v1999_v40, %v711_v2 }
 0x7e2   :  { %v713_v4 = vadd.f32 %v1999_v40, %v712_v3 }
 0x7e4   :  { %v717_v7 = vsel %vm716_vm9, %v1999_v40, %v713_v4  ;;  %v795_v4 = vld.sshfl [vmem:[#allocation1 + $0x10] sm:$0xff pattern:$0x73625140] }
 0x7e5   :  { %v722_v50 = vsel %vm719_vm10, %v721_v39, %v717_v7 }
 0x7e6   :  { %v758_v53 = vmul.f32 %v722_v50, %v2573_v60 }
 0x845   :  { %v763_v34 = vpop.permute.xlu0 %762 }
 0x846   :  { %v765_v42 = vpop.permute.xlu1 %764 }
 0x847   :  { %v766_v43 = vsel %vm234_vm12, %v763_v34, %v765_v42 }
 0x848   :  { %v768_v45 = vmul.f32 %v766_v43, %v722_v50 }
 0x84a   :  { %770 = vrot.lane.b32.xlu2 %v768_v45, %s2205_s25 }
 0x8a4   :  { %v771_v52 = vpop.permute.xlu2 %770 }
 0x8a5   :  { %v2700_v54 = vadd.f32 %v771_v52, %v758_v53  ;;  %v2702_v47 = vadd.f32 %v771_v52, %v759_v20 }
 0x8a7   :  { %2000 = vtanh.f32 %v2700_v54 }
 0x8a8   :  { %2002 = vtanh.f32 %v2702_v47 }
 0x8ad   :  { %v2001_v56 = vpop.eup %2000 }
 0x8ae   :  { %v2003_v57 = vpop.eup %2002  ;;  %779 = vrot.lane.b32.xlu0 %v2001_v56, %s2211_s1 }
 0x8af   :  { %781 = vrot.lane.b32.xlu1 %v2003_v57, %s2211_s1 }
 0x920   :  { %v780_v61 = vpop.permute.xlu0 %779 }
 0x921   :  { %v782_v49 = vpop.permute.xlu1 %781 }
 0x922   :  { %v783_v60 = vsel %vm234_vm12, %v780_v61, %v782_v49 }
 0x923   :  { %v785_v46 = vmul.f32 %v783_v60, %v752_v44  ;;  %v794_v44 = vld.sshfl [vmem:[#allocation1 + $0x8] sm:$0xff pattern:$0x73625140] }
 0x925   :  { %789 = vrot.lane.b32.xlu2 %v785_v46, %s2205_s25 }
 0x97f   :  { %v790_v40 = vpop.permute.xlu2 %789 }
 0x980   :  { %1880 = vmatmul.msk.f32.vlgmr.msrb.gmra.mxu0 %vm101_vm15, %v790_v40  ;;  %1881 = vmatmul.msk.f32.vlgmr.msrb.gmra.mxu1 %vm101_vm15, %v790_v40 }
 0x981   :  { %1882 = vmatmul.msk.f32.vlgmr.msrb.gmra.mxu2 %vm101_vm15, %v790_v40  ;;  %1173 = vmatpush.msrb.mxu0 %v2586_v8 }
 0x982   :  { %1297 = vmatpush.msrb.mxu1 %v2589_v9  ;;  %1317 = vmatpush.msrb.mxu2 %v2592_v10 }
 0x983   :  { %1174 = vmatpush.msrb.mxu0 %v2595_v11 }
 0x984   :  { %1298 = vmatpush.msrb.mxu1 %v2598_v12  ;;  %1318 = vmatpush.msrb.mxu2 %v2601_v13 }
 0x985   :  { %1175 = vmatpush.msrb.mxu0 %v2604_v14 }
 0x986   :  { %1299 = vmatpush.msrb.mxu1 %v2607_v15  ;;  %1319 = vmatpush.msrb.mxu2 %v2610_v16 }
 0x987   :  { %1176 = vmatpush.msrb.mxu0 %v2613_v17 }
 0x988   :  { %1300 = vmatpush.msrb.mxu1 %v2616_v18  ;;  %1320 = vmatpush.msrb.mxu2 %v2619_v19 }
 0x989   :  { %1177 = vmatpush.msrb.mxu0 %v2622_v21 }
 0x98a   :  { %1301 = vmatpush.msrb.mxu1 %v2625_v22  ;;  %1321 = vmatpush.msrb.mxu2 %v2628_v23 }
 0x98b   :  { %1178 = vmatpush.msrb.mxu0 %v2631_v24 }
 0x98c   :  { %1302 = vmatpush.msrb.mxu1 %v2634_v25  ;;  %1322 = vmatpush.msrb.mxu2 %v2637_v26 }
 0x98d   :  { %1179 = vmatpush.msrb.mxu0 %v2640_v27 }
 0x98e   :  { %1303 = vmatpush.msrb.mxu1 %v2643_v28  ;;  %1323 = vmatpush.msrb.mxu2 %v2646_v29 }
 0x98f   :  { %1180 = vmatpush.msrb.mxu0 %v2649_v30 }
 0x990   :  { %1304 = vmatpush.msrb.mxu1 %v2652_v31  ;;  %1324 = vmatpush.msrb.mxu2 %v2655_v32 }
 0x991   :  { %1181 = vmatpush.msrb.mxu0 %v2658_v33 }
 0x992   :  { %1305 = vmatpush.msrb.mxu1 %v2661_v35  ;;  %1325 = vmatpush.msrb.mxu2 %v2664_v36 }
 0x993   :  { %1182 = vmatpush.msrb.mxu0 %v2667_v37 }
 0x994   :  { %1306 = vmatpush.msrb.mxu1 %v2670_v38  ;;  %1326 = vmatpush.msrb.mxu2 %v2673_v58 }
 0x995   :  { %1183 = vmatpush.msrb.mxu0 %v2676_v59 }
 0x996   :  { %1307 = vmatpush.msrb.mxu1 %v2679_v41  ;;  %1327 = vmatpush.msrb.mxu2 %v2682_v63 }
 0x997   :  { %1184 = vmatpush.msrb.mxu0 %v2685_v0 }
 0x998   :  { %1308 = vmatpush.msrb.mxu1 %v2688_v48  ;;  %1328 = vmatpush.msrb.mxu2 %v2691_v62 }
 0x9fd   :  { %v838_v1 = vpop.f32.mrf.mxu1 }
 0x9fe   :  { %v839_v2 = vadd.f32 %v838_v1, %v794_v44 }
 0xa00   :  { %v1884_v3 = vmul.f32 -1.442695, %v839_v2 }
 0xa02   :  { %2004 = vpow2.f32 %v1884_v3 }
 0xa04   :  { %v858_v5 = vpop.f32.mrf.mxu2 }
 0xa05   :  { %v859_v6 = vadd.f32 %v858_v5, %v795_v4 }
 0xa07   :  { %v1885_v7 = vmul.f32 -1.442695, %v859_v6 }
 0xa08   :  { %v2005_v34 = vpop.eup %2004 }
 0xa09   :  { %2006 = vpow2.f32 %v1885_v7  ;;  %v871_v39 = vadd.f32 1.0, %v2005_v34 }
 0xa0b   :  { %2008 = vrcp.f32 %v871_v39  ;;  %v899_v20 = vand.u32 2147483648, %v871_v39  ;;  %v897_v56 = vand.u32 2147483647, %v871_v39  ;;  %vm893_vm14 = vweird.f32 %v871_v39 }
 0xa0d   :  { %v900_v60 = vor.u32 1.1754944e-38, %v899_v20  ;;  %vm898_vm1 = vcmp.eq.f32.partialorder %v897_v56, 8.507059e+37 }
 0xa0f   :  { %v2007_v42 = vpop.eup %2006 }
 0xa10   :  { %v872_v43 = vadd.f32 1.0, %v2007_v42 }
 0xa11   :  { %v2009_v50 = vpop.eup %2008 }
 0xa12   :  { %2010 = vrcp.f32 %v872_v43  ;;  %v889_v45 = vmul.f32 %v2009_v50, %v871_v39  ;;  %vm894_vm11 = vweird.f32 %v2009_v50  ;;  %v914_v44 = vand.u32 2147483648, %v872_v43 }
 0xa13   :  { %vm895_vm0 = vmor %vm893_vm14, %vm894_vm11  ;;  %v912_v3 = vand.u32 2147483647, %v872_v43  ;;  %vm908_vm3 = vweird.f32 %v872_v43 }
 0xa14   :  { %v890_v53 = vsub.f32 1.0, %v889_v45  ;;  %v915_v6 = vor.u32 1.1754944e-38, %v914_v44  ;;  %v818_v45 = vpop.f32.mrf.mxu0 }
 0xa15   :  { %vm913_vm5 = vcmp.eq.f32.partialorder %v912_v3, 8.507059e+37 }
 0xa16   :  { %v891_v52 = vmul.f32 %v2009_v50, %v890_v53 }
 0xa18   :  { %v2011_v57 = vpop.eup %2010  ;;  %v892_v49 = vadd.f32 %v2009_v50, %v891_v52 }
 0xa19   :  { %v904_v61 = vmul.f32 %v2011_v57, %v872_v43  ;;  %vm909_vm2 = vweird.f32 %v2011_v57 }
 0xa1a   :  { %v896_v46 = vsel %vm895_vm0, %v2009_v50, %v892_v49  ;;  %vm910_vm4 = vmor %vm908_vm3, %vm909_vm2  ;;  %v793_v50 = vld.sshfl [vmem:[#allocation1] sm:$0xff pattern:$0x73625140] }
 0xa1b   :  { %v905_v51 = vsub.f32 1.0, %v904_v61  ;;  %v901_v40 = vsel %vm898_vm1, %v900_v60, %v896_v46  ;;  %v819_v53 = vadd.f32 %v818_v45, %v793_v50 }
 0xa1c   :  { %v918_v1 = vmul.f32 2.0, %v901_v40 }
 0xa1d   :  { %v906_v2 = vmul.f32 %v2011_v57, %v905_v51  ;;  %v1883_v20 = vmul.f32 -1.442695, %v819_v53 }
 0xa1e   :  { %v1886_v4 = vadd.f32 -1.0, %v918_v1 }
 0xa1f   :  { %v907_v5 = vadd.f32 %v2011_v57, %v906_v2  ;;  %2012 = vpow2.f32 %v1883_v20 }
 0xa20   :  { %926 = vrot.lane.b32.xlu0 %v1886_v4, %s2211_s1 }
 0xa21   :  { %v911_v7 = vsel %vm910_vm4, %v2011_v57, %v907_v5 }
 0xa22   :  { %v916_v34 = vsel %vm913_vm5, %v915_v6, %v911_v7 }
 0xa23   :  { %v919_v39 = vmul.f32 2.0, %v916_v34 }
 0xa25   :  { %v1887_v42 = vadd.f32 -1.0, %v919_v39  ;;  %v2013_v52 = vpop.eup %2012  ;;  %v923_v39 = vmul.f32 %v901_v40, %v2702_v47  ;;  %v951_v40 = vld [vmem:[#allocation3 + $0x1e] sm:$0x3f] }
 0xa26   :  { %v870_v56 = vadd.f32 1.0, %v2013_v52  ;;  %956 = vst [vmem:[#allocation1] ss:$4 sm:$0xff] %v951_v40 }
 0xa27   :  { %928 = vrot.lane.b32.xlu1 %v1887_v42, %s2211_s1 }
 0xa28   :  { %2014 = vrcp.f32 %v870_v56  ;;  %v884_v57 = vand.u32 2147483648, %v870_v56  ;;  %vm878_vm7 = vweird.f32 %v870_v56  ;;  %v882_v51 = vand.u32 2147483647, %v870_v56 }
 0xa2a   :  { %v885_v1 = vor.u32 1.1754944e-38, %v884_v57  ;;  %vm883_vm9 = vcmp.eq.f32.partialorder %v882_v51, 8.507059e+37 }
 0xa2e   :  { %v2015_v43 = vpop.eup %2014 }
 0xa2f   :  { %v874_v61 = vmul.f32 %v2015_v43, %v870_v56  ;;  %vm879_vm6 = vweird.f32 %v2015_v43 }
 0xa30   :  { %vm880_vm8 = vmor %vm878_vm7, %vm879_vm6 }
 0xa31   :  { %v875_v49 = vsub.f32 1.0, %v874_v61  ;;  %v959_v61 = vld.sshfl [vmem:[#allocation1 + $0x10] sm:$0xff pattern:$0x73625140] }
 0xa33   :  { %v876_v60 = vmul.f32 %v2015_v43, %v875_v49 }
 0xa35   :  { %v877_v46 = vadd.f32 %v2015_v43, %v876_v60 }
 0xa37   :  { %v881_v44 = vsel %vm880_vm8, %v2015_v43, %v877_v46 }
 0xa38   :  { %v886_v5 = vsel %vm883_vm9, %v885_v1, %v881_v44 }
 0xa39   :  { %v922_v7 = vmul.f32 %v886_v5, %v2700_v54 }
 0xa92   :  { %v927_v2 = vpop.permute.xlu0 %926 }
 0xa99   :  { %v929_v3 = vpop.permute.xlu1 %928 }
 0xa9a   :  { %v930_v4 = vsel %vm234_vm12, %v927_v2, %v929_v3 }
 0xa9b   :  { %v932_v6 = vmul.f32 %v930_v4, %v886_v5 }
 0xa9d   :  { %934 = vrot.lane.b32.xlu2 %v932_v6, %s2205_s25 }
 0xaf7   :  { %v935_v42 = vpop.permute.xlu2 %934 }
 0xaf8   :  { %v2755_v50 = vadd.f32 %v935_v42, %v922_v7  ;;  %v2757_v45 = vadd.f32 %v935_v42, %v923_v39 }
 0xafa   :  { %2016 = vtanh.f32 %v2755_v50 }
 0xafb   :  { %2018 = vtanh.f32 %v2757_v45 }
 0xb00   :  { %v2017_v53 = vpop.eup %2016 }
 0xb01   :  { %v2019_v20 = vpop.eup %2018  ;;  %943 = vrot.lane.b32.xlu0 %v2017_v53, %s2211_s1 }
 0xb02   :  { %945 = vrot.lane.b32.xlu1 %v2019_v20, %s2211_s1 }
 0xb73   :  { %v944_v52 = vpop.permute.xlu0 %943 }
 0xb74   :  { %v946_v56 = vpop.permute.xlu1 %945 }
 0xb75   :  { %v947_v54 = vsel %vm234_vm12, %v944_v52, %v946_v56 }
 0xb76   :  { %v949_v47 = vmul.f32 %v947_v54, %v916_v34  ;;  %v958_v34 = vld.sshfl [vmem:[#allocation1 + $0x8] sm:$0xff pattern:$0x73625140] }
 0xb78   :  { %953 = vrot.lane.b32.xlu2 %v949_v47, %s2205_s25 }
 0xbd2   :  { %v954_v43 = vpop.permute.xlu2 %953 }
 0xbd3   :  { %1888 = vmatmul.msk.f32.vlgmr.msrb.gmra.mxu3 %vm101_vm15, %v954_v43  ;;  %1889 = vmatmul.msk.f32.vlgmr.msra.gmra.mxu0 %vm101_vm15, %v954_v43 }
 0xbd4   :  { %1890 = vmatmul.msk.f32.vlgmr.msra.gmra.mxu1 %vm101_vm15, %v954_v43  ;;  %1337 = vmatpush.msrb.mxu3 %v2586_v8 }
 0xbd5   :  { %1461 = vmatpush.msra.mxu0 %v2589_v9  ;;  %1481 = vmatpush.msra.mxu1 %v2592_v10 }
 0xbd6   :  { %1338 = vmatpush.msrb.mxu3 %v2595_v11 }
 0xbd7   :  { %1462 = vmatpush.msra.mxu0 %v2598_v12  ;;  %1482 = vmatpush.msra.mxu1 %v2601_v13 }
 0xbd8   :  { %1339 = vmatpush.msrb.mxu3 %v2604_v14 }
 0xbd9   :  { %1463 = vmatpush.msra.mxu0 %v2607_v15  ;;  %1483 = vmatpush.msra.mxu1 %v2610_v16 }
 0xbda   :  { %1340 = vmatpush.msrb.mxu3 %v2613_v17 }
 0xbdb   :  { %1464 = vmatpush.msra.mxu0 %v2616_v18  ;;  %1484 = vmatpush.msra.mxu1 %v2619_v19 }
 0xbdc   :  { %1341 = vmatpush.msrb.mxu3 %v2622_v21 }
 0xbdd   :  { %1465 = vmatpush.msra.mxu0 %v2625_v22  ;;  %1485 = vmatpush.msra.mxu1 %v2628_v23 }
 0xbde   :  { %1342 = vmatpush.msrb.mxu3 %v2631_v24 }
 0xbdf   :  { %1466 = vmatpush.msra.mxu0 %v2634_v25  ;;  %1486 = vmatpush.msra.mxu1 %v2637_v26 }
 0xbe0   :  { %1343 = vmatpush.msrb.mxu3 %v2640_v27 }
 0xbe1   :  { %1467 = vmatpush.msra.mxu0 %v2643_v28  ;;  %1487 = vmatpush.msra.mxu1 %v2646_v29 }
 0xbe2   :  { %1344 = vmatpush.msrb.mxu3 %v2649_v30 }
 0xbe3   :  { %1468 = vmatpush.msra.mxu0 %v2652_v31  ;;  %1488 = vmatpush.msra.mxu1 %v2655_v32 }
 0xbe4   :  { %1345 = vmatpush.msrb.mxu3 %v2658_v33 }
 0xbe5   :  { %1469 = vmatpush.msra.mxu0 %v2661_v35  ;;  %1489 = vmatpush.msra.mxu1 %v2664_v36 }
 0xbe6   :  { %1346 = vmatpush.msrb.mxu3 %v2667_v37 }
 0xbe7   :  { %1470 = vmatpush.msra.mxu0 %v2670_v38  ;;  %1490 = vmatpush.msra.mxu1 %v2673_v58 }
 0xbe8   :  { %1347 = vmatpush.msrb.mxu3 %v2676_v59 }
 0xbe9   :  { %1471 = vmatpush.msra.mxu0 %v2679_v41  ;;  %1491 = vmatpush.msra.mxu1 %v2682_v63 }
 0xbea   :  { %1348 = vmatpush.msrb.mxu3 %v2685_v0 }
 0xbeb   :  { %1472 = vmatpush.msra.mxu0 %v2688_v48  ;;  %1492 = vmatpush.msra.mxu1 %v2691_v62 }
 0xc50   :  { %v1002_v49 = vpop.f32.mrf.mxu0 }
 0xc51   :  { %v1003_v60 = vadd.f32 %v1002_v49, %v958_v34  ;;  %v1022_v46 = vpop.f32.mrf.mxu1 }
 0xc52   :  { %v1023_v57 = vadd.f32 %v1022_v46, %v959_v61 }
 0xc53   :  { %v1892_v51 = vmul.f32 -1.442695, %v1003_v60 }
 0xc54   :  { %v1893_v44 = vmul.f32 -1.442695, %v1023_v57 }
 0xc55   :  { %2020 = vpow2.f32 %v1892_v51 }
 0xc56   :  { %2022 = vpow2.f32 %v1893_v44 }
 0xc5b   :  { %v2021_v1 = vpop.eup %2020 }
 0xc5c   :  { %v2023_v2 = vpop.eup %2022  ;;  %v1035_v3 = vadd.f32 1.0, %v2021_v1 }
 0xc5d   :  { %v1036_v4 = vadd.f32 1.0, %v2023_v2 }
 0xc5e   :  { %2024 = vrcp.f32 %v1035_v3  ;;  %v1063_v20 = vand.u32 2147483648, %v1035_v3  ;;  %v1061_v54 = vand.u32 2147483647, %v1035_v3  ;;  %vm1057_vm14 = vweird.f32 %v1035_v3 }
 0xc5f   :  { %2026 = vrcp.f32 %v1036_v4  ;;  %v1078_v52 = vand.u32 2147483648, %v1036_v4  ;;  %v1076_v40 = vand.u32 2147483647, %v1036_v4  ;;  %vm1072_vm0 = vweird.f32 %v1036_v4 }
 0xc60   :  { %v1064_v61 = vor.u32 1.1754944e-38, %v1063_v20  ;;  %vm1062_vm3 = vcmp.eq.f32.partialorder %v1061_v54, 8.507059e+37 }
 0xc61   :  { %v1079_v49 = vor.u32 1.1754944e-38, %v1078_v52  ;;  %vm1077_vm4 = vcmp.eq.f32.partialorder %v1076_v40, 8.507059e+37 }
 0xc64   :  { %v2025_v5 = vpop.eup %2024 }
 0xc65   :  { %v2027_v6 = vpop.eup %2026  ;;  %v1053_v7 = vmul.f32 %v2025_v5, %v1035_v3  ;;  %vm1058_vm10 = vweird.f32 %v2025_v5  ;;  %v957_v3 = vld.sshfl [vmem:[#allocation1] sm:$0xff pattern:$0x73625140] }
 0xc66   :  { %v1068_v39 = vmul.f32 %v2027_v6, %v1036_v4  ;;  %vm1073_vm11 = vweird.f32 %v2027_v6  ;;  %vm1059_vm1 = vmor %vm1057_vm14, %vm1058_vm10  ;;  %v982_v4 = vpop.f32.mrf.mxu3 }
 0xc67   :  { %v1054_v42 = vsub.f32 1.0, %v1053_v7  ;;  %vm1074_vm2 = vmor %vm1072_vm0, %vm1073_vm11 }
 0xc68   :  { %v1069_v53 = vsub.f32 1.0, %v1068_v39  ;;  %v983_v39 = vadd.f32 %v982_v4, %v957_v3 }
 0xc69   :  { %v1055_v56 = vmul.f32 %v2025_v5, %v1054_v42 }
 0xc6a   :  { %v1070_v47 = vmul.f32 %v2027_v6, %v1069_v53  ;;  %v1891_v42 = vmul.f32 -1.442695, %v983_v39 }
 0xc6b   :  { %v1056_v43 = vadd.f32 %v2025_v5, %v1055_v56 }
 0xc6c   :  { %v1071_v34 = vadd.f32 %v2027_v6, %v1070_v47  ;;  %2028 = vpow2.f32 %v1891_v42 }
 0xc6d   :  { %v1060_v60 = vsel %vm1059_vm1, %v2025_v5, %v1056_v43 }
 0xc6e   :  { %v1075_v46 = vsel %vm1074_vm2, %v2027_v6, %v1071_v34  ;;  %v1065_v57 = vsel %vm1062_vm3, %v1064_v61, %v1060_v60 }
 0xc6f   :  { %v1080_v51 = vsel %vm1077_vm4, %v1079_v49, %v1075_v46  ;;  %v1082_v44 = vmul.f32 2.0, %v1065_v57 }
 0xc70   :  { %v1083_v1 = vmul.f32 2.0, %v1080_v51 }
 0xc71   :  { %v1894_v2 = vadd.f32 -1.0, %v1082_v44 }
 0xc72   :  { %v1895_v7 = vadd.f32 -1.0, %v1083_v1  ;;  %v2029_v53 = vpop.eup %2028 }
 0xc73   :  { %1090 = vrot.lane.b32.xlu0 %v1894_v2, %s2211_s1  ;;  %v1034_v5 = vadd.f32 1.0, %v2029_v53  ;;  %v1087_v2 = vmul.f32 %v1065_v57, %v2757_v45  ;;  %v1115_v57 = vld [vmem:[#allocation3 + $0x24] sm:$0x3f] }
 0xc74   :  { %1092 = vrot.lane.b32.xlu1 %v1895_v7, %s2211_s1  ;;  %1120 = vst [vmem:[#allocation1] ss:$4 sm:$0xff] %v1115_v57 }
 0xc75   :  { %2030 = vrcp.f32 %v1034_v5  ;;  %v1048_v47 = vand.u32 2147483648, %v1034_v5  ;;  %vm1042_vm6 = vweird.f32 %v1034_v5  ;;  %v1046_v40 = vand.u32 2147483647, %v1034_v5 }
 0xc77   :  { %v1049_v61 = vor.u32 1.1754944e-38, %v1048_v47  ;;  %vm1047_vm8 = vcmp.eq.f32.partialorder %v1046_v40, 8.507059e+37 }
 0xc7b   :  { %v2031_v6 = vpop.eup %2030 }
 0xc7c   :  { %v1038_v20 = vmul.f32 %v2031_v6, %v1034_v5  ;;  %vm1043_vm5 = vweird.f32 %v2031_v6 }
 0xc7d   :  { %vm1044_vm7 = vmor %vm1042_vm6, %vm1043_vm5 }
 0xc7e   :  { %v1039_v52 = vsub.f32 1.0, %v1038_v20 }
 0xc80   :  { %v1040_v56 = vmul.f32 %v2031_v6, %v1039_v52 }
 0xc82   :  { %v1041_v54 = vadd.f32 %v2031_v6, %v1040_v56 }
 0xc84   :  { %v1045_v43 = vsel %vm1044_vm7, %v2031_v6, %v1041_v54 }
 0xc85   :  { %v1050_v46 = vsel %vm1047_vm8, %v1049_v61, %v1045_v43 }
 0xc86   :  { %v1086_v1 = vmul.f32 %v1050_v46, %v2755_v50 }
 0xce5   :  { %v1091_v34 = vpop.permute.xlu0 %1090 }
 0xce6   :  { %v1093_v49 = vpop.permute.xlu1 %1092 }
 0xce7   :  { %v1094_v60 = vsel %vm234_vm12, %v1091_v34, %v1093_v49 }
 0xce8   :  { %v1096_v44 = vmul.f32 %v1094_v60, %v1050_v46 }
 0xcea   :  { %1098 = vrot.lane.b32.xlu2 %v1096_v44, %s2205_s25 }
 0xd44   :  { %v1099_v7 = vpop.permute.xlu2 %1098 }
 0xd45   :  { %v2810_v3 = vadd.f32 %v1099_v7, %v1086_v1  ;;  %v2812_v4 = vadd.f32 %v1099_v7, %v1087_v2 }
 0xd47   :  { %2032 = vtanh.f32 %v2810_v3 }
 0xd48   :  { %2034 = vtanh.f32 %v2812_v4 }
 0xd4d   :  { %v2033_v39 = vpop.eup %2032 }
 0xd4e   :  { %v2035_v42 = vpop.eup %2034  ;;  %1107 = vrot.lane.b32.xlu0 %v2033_v39, %s2211_s1 }
 0xd4f   :  { %1109 = vrot.lane.b32.xlu1 %v2035_v42, %s2211_s1 }
 0xdc0   :  { %v1108_v53 = vpop.permute.xlu0 %1107 }
 0xdc1   :  { %v1110_v5 = vpop.permute.xlu1 %1109 }
 0xdc2   :  { %v1111_v50 = vsel %vm234_vm12, %v1108_v53, %v1110_v5 }
 0xdc3   :  { %v1113_v45 = vmul.f32 %v1111_v50, %v1080_v51  ;;  %v1121_v51 = vld.sshfl [vmem:[#allocation1] sm:$0xff pattern:$0x73625140] }
 0xdc5   :  { %1117 = vrot.lane.b32.xlu2 %v1113_v45, %s2205_s25 }
 0xe1f   :  { %v1118_v6 = vpop.permute.xlu2 %1117 }
 0xe20   :  { %1896 = vmatmul.msk.f32.vlgmr.msra.gmra.mxu2 %vm101_vm15, %v1118_v6  ;;  %1897 = vmatmul.msk.f32.vlgmr.msra.gmra.mxu3 %vm101_vm15, %v1118_v6 }
 0xe21   :  { %1898 = vmatmul.msk.f32.vlgmr.msrb.gmra.mxu0 %vm101_vm15, %v1118_v6  ;;  %1501 = vmatpush.msra.mxu2 %v2586_v8  ;;  %v1123_v8 = vld.sshfl [vmem:[#allocation1 + $0x10] sm:$0xff pattern:$0x73625140] }
 0xe22   :  { %1647 = vmatpush.msra.mxu3 %v2589_v9  ;;  %1667 = vmatpush.msrb.mxu0 %v2592_v10 }
 0xe23   :  { %1502 = vmatpush.msra.mxu2 %v2595_v11 }
 0xe24   :  { %1648 = vmatpush.msra.mxu3 %v2598_v12  ;;  %1668 = vmatpush.msrb.mxu0 %v2601_v13  ;;  %v1122_v12 = vld.sshfl [vmem:[#allocation1 + $0x8] sm:$0xff pattern:$0x73625140] }
 0xe25   :  { %1503 = vmatpush.msra.mxu2 %v2604_v14 }
 0xe26   :  { %1649 = vmatpush.msra.mxu3 %v2607_v15  ;;  %1669 = vmatpush.msrb.mxu0 %v2610_v16 }
 0xe27   :  { %1504 = vmatpush.msra.mxu2 %v2613_v17 }
 0xe28   :  { %1650 = vmatpush.msra.mxu3 %v2616_v18  ;;  %1670 = vmatpush.msrb.mxu0 %v2619_v19 }
 0xe29   :  { %1505 = vmatpush.msra.mxu2 %v2622_v21 }
 0xe2a   :  { %1651 = vmatpush.msra.mxu3 %v2625_v22  ;;  %1671 = vmatpush.msrb.mxu0 %v2628_v23 }
 0xe2b   :  { %1506 = vmatpush.msra.mxu2 %v2631_v24 }
 0xe2c   :  { %1652 = vmatpush.msra.mxu3 %v2634_v25  ;;  %1672 = vmatpush.msrb.mxu0 %v2637_v26 }
 0xe2d   :  { %1507 = vmatpush.msra.mxu2 %v2640_v27 }
 0xe2e   :  { %1653 = vmatpush.msra.mxu3 %v2643_v28  ;;  %1673 = vmatpush.msrb.mxu0 %v2646_v29 }
 0xe2f   :  { %1508 = vmatpush.msra.mxu2 %v2649_v30 }
 0xe30   :  { %1654 = vmatpush.msra.mxu3 %v2652_v31  ;;  %1674 = vmatpush.msrb.mxu0 %v2655_v32 }
 0xe31   :  { %1509 = vmatpush.msra.mxu2 %v2658_v33 }
 0xe32   :  { %1655 = vmatpush.msra.mxu3 %v2661_v35  ;;  %1675 = vmatpush.msrb.mxu0 %v2664_v36 }
 0xe33   :  { %1510 = vmatpush.msra.mxu2 %v2667_v37 }
 0xe34   :  { %1656 = vmatpush.msra.mxu3 %v2670_v38  ;;  %1676 = vmatpush.msrb.mxu0 %v2673_v58 }
 0xe35   :  { %1511 = vmatpush.msra.mxu2 %v2676_v59 }
 0xe36   :  { %1657 = vmatpush.msra.mxu3 %v2679_v41  ;;  %1677 = vmatpush.msrb.mxu0 %v2682_v63 }
 0xe37   :  { %1512 = vmatpush.msra.mxu2 %v2685_v0 }
 0xe38   :  { %1658 = vmatpush.msra.mxu3 %v2688_v48  ;;  %1678 = vmatpush.msrb.mxu0 %v2691_v62 }
 0xe9e   :  { %v1186_v9 = vpop.f32.mrf.mxu0 }
 0xe9f   :  { %v1187_v10 = vadd.f32 %v1186_v9, %v1123_v8 }
 0xea1   :  { %v1901_v11 = vmul.f32 -1.442695, %v1187_v10 }
 0xea3   :  { %2036 = vpow2.f32 %v1901_v11  ;;  %v1166_v13 = vpop.f32.mrf.mxu3  ;;  %v1146_v20 = vpop.f32.mrf.mxu2 }
 0xea4   :  { %v1167_v14 = vadd.f32 %v1166_v13, %v1122_v12  ;;  %v1147_v52 = vadd.f32 %v1146_v20, %v1121_v51  ;;  %v2875_v12 = vld [vmem:[#allocation3 + $0x2a] sm:$0x3f] }
 0xea5   :  { %1284 = vst [vmem:[#allocation1] ss:$4 sm:$0xff] %v2875_v12 }
 0xea6   :  { %v1900_v15 = vmul.f32 -1.442695, %v1167_v14  ;;  %v1899_v56 = vmul.f32 -1.442695, %v1147_v52  ;;  %v2140_v14 = vld [vmem:[#allocation5 + $0x118] sm:$0xff] }
 0xea8   :  { %2038 = vpow2.f32 %v1900_v15  ;;  %v2141_v15 = vld [vmem:[#allocation5 + $0x100] sm:$0xff] }
 0xea9   :  { %v2037_v16 = vpop.eup %2036 }
 0xeaa   :  { %v1200_v17 = vadd.f32 1.0, %v2037_v16  ;;  %v2142_v16 = vld [vmem:[#allocation5 + $0xe8] sm:$0xff] }
 0xeac   :  { %2040 = vrcp.f32 %v1200_v17  ;;  %v1242_v24 = vand.u32 2147483648, %v1200_v17  ;;  %v1240_v26 = vand.u32 2147483647, %v1200_v17  ;;  %vm1236_vm10 = vweird.f32 %v1200_v17 }
 0xeae   :  { %v2039_v18 = vpop.eup %2038  ;;  %v1243_v30 = vor.u32 1.1754944e-38, %v1242_v24  ;;  %vm1241_vm14 = vcmp.eq.f32.partialorder %v1240_v26, 8.507059e+37  ;;  %v2149_v24 = vld [vmem:[#allocation5 + $0x40] sm:$0xff]  ;;  %v2151_v26 = vld [vmem:[#allocation5 + $0x10] sm:$0xff] }
 0xeaf   :  { %v1199_v19 = vadd.f32 1.0, %v2039_v18  ;;  %v2144_v18 = vld [vmem:[#allocation5 + $0xb8] sm:$0xff] }
 0xeb1   :  { %2042 = vrcp.f32 %v1199_v19  ;;  %v1227_v35 = vand.u32 2147483648, %v1199_v19  ;;  %v1225_v38 = vand.u32 2147483647, %v1199_v19  ;;  %vm1221_vm1 = vweird.f32 %v1199_v19 }
 0xeb2   :  { %v2041_v21 = vpop.eup %2040  ;;  %2044 = vpow2.f32 %v1899_v56 }
 0xeb3   :  { %v1232_v22 = vmul.f32 %v2041_v21, %v1200_v17  ;;  %vm1237_vm9 = vweird.f32 %v2041_v21  ;;  %v1228_v41 = vor.u32 1.1754944e-38, %v1227_v35  ;;  %vm1226_vm3 = vcmp.eq.f32.partialorder %v1225_v38, 8.507059e+37  ;;  %v2143_v17 = vld [vmem:[#allocation5 + $0xd0] sm:$0xff] }
 0xeb4   :  { %vm1238_vm11 = vmor %vm1236_vm10, %vm1237_vm9 }
 0xeb5   :  { %v1233_v23 = vsub.f32 1.0, %v1232_v22  ;;  %v2147_v22 = vld [vmem:[#allocation5 + $0x70] sm:$0xff] }
 0xeb7   :  { %v1234_v25 = vmul.f32 %v2041_v21, %v1233_v23  ;;  %v2043_v27 = vpop.eup %2042  ;;  %v2148_v23 = vld [vmem:[#allocation5 + $0x58] sm:$0xff] }
 0xeb8   :  { %v1217_v28 = vmul.f32 %v2043_v27, %v1199_v19  ;;  %vm1222_vm0 = vweird.f32 %v2043_v27  ;;  %v2045_v54 = vpop.eup %2044  ;;  %v2145_v19 = vld [vmem:[#allocation5 + $0xa0] sm:$0xff] }
 0xeb9   :  { %v1235_v29 = vadd.f32 %v2041_v21, %v1234_v25  ;;  %vm1223_vm2 = vmor %vm1221_vm1, %vm1222_vm0  ;;  %v1198_v47 = vadd.f32 1.0, %v2045_v54  ;;  %v2150_v25 = vld [vmem:[#allocation5 + $0x28] sm:$0xff] }
 0xeba   :  { %v1218_v32 = vsub.f32 1.0, %v1217_v28  ;;  %v1286_v28 = vld.sshfl [vmem:[#allocation1 + $0x8] sm:$0xff pattern:$0x73625140] }
 0xebb   :  { %v1239_v31 = vsel %vm1238_vm11, %v2041_v21, %v1235_v29  ;;  %2046 = vrcp.f32 %v1198_v47  ;;  %v1212_v60 = vand.u32 2147483648, %v1198_v47  ;;  %vm1206_vm5 = vweird.f32 %v1198_v47  ;;  %v2146_v21 = vld [vmem:[#allocation5 + $0x88] sm:$0xff]  ;;  %v1287_v29 = vld.sshfl [vmem:[#allocation1 + $0x10] sm:$0xff pattern:$0x73625140] }
 0xebc   :  { %v1244_v33 = vsel %vm1241_vm14, %v1243_v30, %v1239_v31  ;;  %v1219_v37 = vmul.f32 %v2043_v27, %v1218_v32  ;;  %v1210_v46 = vand.u32 2147483647, %v1198_v47 }
 0xebd   :  { %v1247_v36 = vmul.f32 2.0, %v1244_v33  ;;  %v1213_v1 = vor.u32 1.1754944e-38, %v1212_v60 }
 0xebe   :  { %v1220_v59 = vadd.f32 %v2043_v27, %v1219_v37  ;;  %vm1211_vm7 = vcmp.eq.f32.partialorder %v1210_v46, 8.507059e+37 }
 0xebf   :  { %v1903_v58 = vadd.f32 -1.0, %v1247_v36 }
 0xec0   :  { %v1224_v63 = vsel %vm1223_vm2, %v2043_v27, %v1220_v59  ;;  %v1285_v27 = vld.sshfl [vmem:[#allocation1] sm:$0xff pattern:$0x73625140] }
 0xec1   :  { %1256 = vrot.lane.b32.xlu1 %v1903_v58, %s2211_s1  ;;  %v1229_v0 = vsel %vm1226_vm3, %v1228_v41, %v1224_v63  ;;  %v2047_v40 = vpop.eup %2046  ;;  %1448 = vst [vmem:[#allocation1] ss:$4 sm:$0xff] %v2875_v12 }
 0xec2   :  { %v1246_v48 = vmul.f32 2.0, %v1229_v0  ;;  %v1202_v43 = vmul.f32 %v2047_v40, %v1198_v47  ;;  %vm1207_vm4 = vweird.f32 %v2047_v40  ;;  %v1251_v50 = vmul.f32 %v1229_v0, %v2812_v4 }
 0xec3   :  { %vm1208_vm6 = vmor %vm1206_vm5, %vm1207_vm4 }
 0xec4   :  { %v1902_v62 = vadd.f32 -1.0, %v1246_v48  ;;  %v1203_v34 = vsub.f32 1.0, %v1202_v43 }
 0xec6   :  { %1254 = vrot.lane.b32.xlu0 %v1902_v62, %s2211_s1  ;;  %v1204_v61 = vmul.f32 %v2047_v40, %v1203_v34 }
 0xec8   :  { %v1205_v49 = vadd.f32 %v2047_v40, %v1204_v61 }
 0xeca   :  { %v1209_v44 = vsel %vm1208_vm6, %v2047_v40, %v1205_v49 }
 0xecb   :  { %v1214_v42 = vsel %vm1211_vm7, %v1213_v1, %v1209_v44 }
 0xecc   :  { %v1250_v5 = vmul.f32 %v1214_v42, %v2810_v3 }
 0xf33   :  { %v1257_v2 = vpop.permute.xlu1 %1256 }
 0xf38   :  { %v1255_v7 = vpop.permute.xlu0 %1254 }
 0xf39   :  { %v1258_v39 = vsel %vm234_vm12, %v1255_v7, %v1257_v2 }
 0xf3a   :  { %v1260_v53 = vmul.f32 %v1258_v39, %v1214_v42 }
 0xf3c   :  { %1262 = vrot.lane.b32.xlu2 %v1260_v53, %s2205_s25 }
 0xf96   :  { %v1263_v45 = vpop.permute.xlu2 %1262 }
 0xf97   :  { %v2865_v57 = vadd.f32 %v1263_v45, %v1250_v5  ;;  %v2867_v6 = vadd.f32 %v1263_v45, %v1251_v50 }
 0xf99   :  { %2048 = vtanh.f32 %v2865_v57 }
 0xf9a   :  { %2050 = vtanh.f32 %v2867_v6 }
 0xf9f   :  { %v2049_v8 = vpop.eup %2048 }
 0xfa0   :  { %v2051_v9 = vpop.eup %2050  ;;  %1271 = vrot.lane.b32.xlu0 %v2049_v8, %s2211_s1 }
 0xfa1   :  { %1273 = vrot.lane.b32.xlu1 %v2051_v9, %s2211_s1 }
0x1012   :  { %v1272_v10 = vpop.permute.xlu0 %1271 }
0x1013   :  { %v1274_v11 = vpop.permute.xlu1 %1273 }
0x1014   :  { %v1275_v3 = vsel %vm234_vm12, %v1272_v10, %v1274_v11 }
0x1015   :  { %v1277_v4 = vmul.f32 %v1275_v3, %v1244_v33 }
0x1017   :  { %1281 = vrot.lane.b32.xlu2 %v1277_v4, %s2205_s25 }
0x1071   :  { %v1282_v13 = vpop.permute.xlu2 %1281 }
0x1072   :  { %1904 = vmatmul.msk.f32.vlgmr.msrb.gmra.mxu1 %vm101_vm15, %v1282_v13  ;;  %1905 = vmatmul.msk.f32.vlgmr.msrb.gmra.mxu2 %vm101_vm15, %v1282_v13 }
0x1073   :  { %1906 = vmatmul.msk.f32.vlgmr.msrb.gmra.mxu3 %vm101_vm15, %v1282_v13  ;;  %1687 = vmatpush.msrb.mxu1 %v2140_v14 }
0x1075   :  { %1688 = vmatpush.msrb.mxu1 %v2141_v15 }
0x1077   :  { %1689 = vmatpush.msrb.mxu1 %v2142_v16 }
0x1079   :  { %1690 = vmatpush.msrb.mxu1 %v2143_v17 }
0x107b   :  { %1691 = vmatpush.msrb.mxu1 %v2144_v18 }
0x107d   :  { %1692 = vmatpush.msrb.mxu1 %v2145_v19 }
0x107f   :  { %1693 = vmatpush.msrb.mxu1 %v2146_v21 }
0x1081   :  { %1694 = vmatpush.msrb.mxu1 %v2147_v22 }
0x1083   :  { %1695 = vmatpush.msrb.mxu1 %v2148_v23 }
0x1085   :  { %1696 = vmatpush.msrb.mxu1 %v2149_v24 }
0x1087   :  { %1697 = vmatpush.msrb.mxu1 %v2150_v25 }
0x1089   :  { %1698 = vmatpush.msrb.mxu1 %v2151_v26 }
0x10ef   :  { %v1310_v53 = vpop.f32.mrf.mxu1 }
0x10f0   :  { %v1311_v5 = vadd.f32 %v1310_v53, %v1285_v27 }
0x10f2   :  { %v1907_v50 = vmul.f32 -1.442695, %v1311_v5 }
0x10f5   :  { %v1330_v30 = vpop.f32.mrf.mxu2 }
0x10f6   :  { %v1331_v31 = vadd.f32 %v1330_v30, %v1286_v28  ;;  %v1350_v32 = vpop.f32.mrf.mxu3 }
0x10f7   :  { %v1351_v33 = vadd.f32 %v1350_v32, %v1287_v29 }
0x10f8   :  { %v1908_v35 = vmul.f32 -1.442695, %v1331_v31 }
0x10f9   :  { %v1909_v36 = vmul.f32 -1.442695, %v1351_v33  ;;  %v1449_v33 = vld.sshfl [vmem:[#allocation1] sm:$0xff pattern:$0x73625140] }
0x10fa   :  { %2052 = vpow2.f32 %v1908_v35  ;;  %v1450_v35 = vld.sshfl [vmem:[#allocation1 + $0x8] sm:$0xff pattern:$0x73625140] }
0x10fb   :  { %2054 = vpow2.f32 %v1909_v36  ;;  %v1451_v36 = vld.sshfl [vmem:[#allocation1 + $0x10] sm:$0xff pattern:$0x73625140] }
0x10fc   :  { %1633 = vst [vmem:[#allocation1] ss:$4 sm:$0xff] %v2875_v12 }
0x1100   :  { %v2053_v37 = vpop.eup %2052 }
0x1101   :  { %v2055_v38 = vpop.eup %2054  ;;  %v1363_v58 = vadd.f32 1.0, %v2053_v37 }
0x1102   :  { %v1364_v59 = vadd.f32 1.0, %v2055_v38 }
0x1103   :  { %2056 = vrcp.f32 %v1363_v58  ;;  %v1391_v20 = vand.u32 2147483648, %v1363_v58  ;;  %v1389_v54 = vand.u32 2147483647, %v1363_v58  ;;  %vm1385_vm10 = vweird.f32 %v1363_v58 }
0x1104   :  { %2058 = vrcp.f32 %v1364_v59  ;;  %v1406_v52 = vand.u32 2147483648, %v1364_v59  ;;  %v1404_v40 = vand.u32 2147483647, %v1364_v59  ;;  %vm1400_vm11 = vweird.f32 %v1364_v59 }
0x1105   :  { %v1392_v61 = vor.u32 1.1754944e-38, %v1391_v20  ;;  %vm1390_vm1 = vcmp.eq.f32.partialorder %v1389_v54, 8.507059e+37  ;;  %2060 = vpow2.f32 %v1907_v50 }
0x1106   :  { %v1407_v49 = vor.u32 1.1754944e-38, %v1406_v52  ;;  %vm1405_vm2 = vcmp.eq.f32.partialorder %v1404_v40, 8.507059e+37 }
0x1109   :  { %v2057_v41 = vpop.eup %2056 }
0x110a   :  { %v2059_v63 = vpop.eup %2058  ;;  %v1381_v0 = vmul.f32 %v2057_v41, %v1363_v58  ;;  %vm1386_vm8 = vweird.f32 %v2057_v41 }
0x110b   :  { %v1396_v48 = vmul.f32 %v2059_v63, %v1364_v59  ;;  %vm1401_vm9 = vweird.f32 %v2059_v63  ;;  %vm1387_vm14 = vmor %vm1385_vm10, %vm1386_vm8  ;;  %v2061_v45 = vpop.eup %2060 }
0x110c   :  { %v1382_v62 = vsub.f32 1.0, %v1381_v0  ;;  %vm1402_vm0 = vmor %vm1400_vm11, %vm1401_vm9  ;;  %v1362_v8 = vadd.f32 1.0, %v2061_v45 }
0x110d   :  { %v1397_v51 = vsub.f32 1.0, %v1396_v48 }
0x110e   :  { %v1383_v56 = vmul.f32 %v2057_v41, %v1382_v62  ;;  %2062 = vrcp.f32 %v1362_v8  ;;  %v1376_v13 = vand.u32 2147483648, %v1362_v8  ;;  %vm1370_vm4 = vweird.f32 %v1362_v8 }
0x110f   :  { %v1398_v47 = vmul.f32 %v2059_v63, %v1397_v51  ;;  %v1374_v14 = vand.u32 2147483647, %v1362_v8 }
0x1110   :  { %v1384_v43 = vadd.f32 %v2057_v41, %v1383_v56  ;;  %v1377_v17 = vor.u32 1.1754944e-38, %v1376_v13 }
0x1111   :  { %v1399_v34 = vadd.f32 %v2059_v63, %v1398_v47  ;;  %vm1375_vm6 = vcmp.eq.f32.partialorder %v1374_v14, 8.507059e+37 }
0x1112   :  { %v1388_v60 = vsel %vm1387_vm14, %v2057_v41, %v1384_v43 }
0x1113   :  { %v1403_v46 = vsel %vm1402_vm0, %v2059_v63, %v1399_v34  ;;  %v1393_v44 = vsel %vm1390_vm1, %v1392_v61, %v1388_v60 }
0x1114   :  { %v1408_v1 = vsel %vm1405_vm2, %v1407_v49, %v1403_v46  ;;  %v1410_v2 = vmul.f32 2.0, %v1393_v44  ;;  %v2063_v9 = vpop.eup %2062  ;;  %v1415_v24 = vmul.f32 %v1393_v44, %v2867_v6 }
0x1115   :  { %v1411_v7 = vmul.f32 2.0, %v1408_v1  ;;  %v1366_v10 = vmul.f32 %v2063_v9, %v1362_v8  ;;  %vm1371_vm3 = vweird.f32 %v2063_v9 }
0x1116   :  { %v1910_v39 = vadd.f32 -1.0, %v1410_v2  ;;  %vm1372_vm5 = vmor %vm1370_vm4, %vm1371_vm3 }
0x1117   :  { %v1911_v42 = vadd.f32 -1.0, %v1411_v7  ;;  %v1367_v11 = vsub.f32 1.0, %v1366_v10 }
0x1118   :  { %1418 = vrot.lane.b32.xlu0 %v1910_v39, %s2211_s1 }
0x1119   :  { %1420 = vrot.lane.b32.xlu1 %v1911_v42, %s2211_s1  ;;  %v1368_v3 = vmul.f32 %v2063_v9, %v1367_v11 }
0x111b   :  { %v1369_v4 = vadd.f32 %v2063_v9, %v1368_v3 }
0x111d   :  { %v1373_v15 = vsel %vm1372_vm5, %v2063_v9, %v1369_v4 }
0x111e   :  { %v1378_v21 = vsel %vm1375_vm6, %v1377_v17, %v1373_v15  ;;  %vm1442_vm6 = vcmp.ge.s32.totalorder %v2462_v55, 32 }
0x111f   :  { %v1414_v23 = vmul.f32 %v1378_v21, %v2865_v57 }
0x118a   :  { %v1419_v16 = vpop.permute.xlu0 %1418 }
0x118b   :  { %v1421_v18 = vpop.permute.xlu1 %1420 }
0x118c   :  { %v1422_v19 = vsel %vm234_vm12, %v1419_v16, %v1421_v18 }
0x118d   :  { %v1424_v22 = vmul.f32 %v1422_v19, %v1378_v21 }
0x118f   :  { %1426 = vrot.lane.b32.xlu2 %v1424_v22, %s2205_s25 }
0x11e9   :  { %v1427_v25 = vpop.permute.xlu2 %1426 }
0x11ea   :  { %v2888_v26 = vadd.f32 %v1427_v25, %v1414_v23  ;;  %v2890_v27 = vadd.f32 %v1427_v25, %v1415_v24 }
0x11ec   :  { %2064 = vtanh.f32 %v2888_v26 }
0x11ed   :  { %2066 = vtanh.f32 %v2890_v27 }
0x11f2   :  { %v2065_v28 = vpop.eup %2064 }
0x11f3   :  { %v2067_v29 = vpop.eup %2066  ;;  %1435 = vrot.lane.b32.xlu0 %v2065_v28, %s2211_s1 }
0x11f4   :  { %1437 = vrot.lane.b32.xlu1 %v2067_v29, %s2211_s1 }
0x1265   :  { %v1436_v30 = vpop.permute.xlu0 %1435 }
0x1266   :  { %v1438_v31 = vpop.permute.xlu1 %1437 }
0x1267   :  { %v1439_v57 = vsel %vm234_vm12, %v1436_v30, %v1438_v31 }
0x1268   :  { %v1441_v6 = vmul.f32 %v1439_v57, %v1408_v1 }
0x126a   :  { %1446 = vrot.lane.b32.xlu2 %v1441_v6, %s2205_s25 }
0x12c4   :  { %v2898_v32 = vpop.permute.xlu2 %1446 }
0x12c5   :  { %1912 = vmatmul.msk.f32.vlgmr.msra.gmra.mxu0 %vm101_vm15, %v2898_v32  ;;  %1913 = vmatmul.msk.f32.vlgmr.msra.gmra.mxu1 %vm101_vm15, %v2898_v32 }
0x12c6   :  { %1914 = vmatmul.msk.f32.vlgmr.msra.gmra.mxu2 %vm101_vm15, %v2898_v32 }
0x1342   :  { %v1494_v37 = vpop.f32.mrf.mxu1  ;;  %v1474_v9 = vpop.f32.mrf.mxu0 }
0x1343   :  { %v1495_v38 = vadd.f32 %v1494_v37, %v1450_v35  ;;  %v1475_v10 = vadd.f32 %v1474_v9, %v1449_v33 }
0x1345   :  { %v1916_v58 = vmul.f32 -1.442695, %v1495_v38  ;;  %v1915_v11 = vmul.f32 -1.442695, %v1475_v10 }
0x1347   :  { %2068 = vpow2.f32 %v1916_v58 }
0x1349   :  { %v1514_v59 = vpop.f32.mrf.mxu2 }
0x134a   :  { %v1515_v41 = vadd.f32 %v1514_v59, %v1451_v36 }
0x134c   :  { %v1917_v63 = vmul.f32 -1.442695, %v1515_v41 }
0x134d   :  { %v2069_v0 = vpop.eup %2068 }
0x134e   :  { %2070 = vpow2.f32 %v1917_v63  ;;  %v1527_v48 = vadd.f32 1.0, %v2069_v0 }
0x1350   :  { %2072 = vrcp.f32 %v1527_v48  ;;  %v1555_v54 = vand.u32 2147483648, %v1527_v48  ;;  %v1553_v12 = vand.u32 2147483647, %v1527_v48  ;;  %vm1549_vm8 = vweird.f32 %v1527_v48 }
0x1352   :  { %v1556_v61 = vor.u32 1.1754944e-38, %v1555_v54  ;;  %vm1554_vm10 = vcmp.eq.f32.partialorder %v1553_v12, 8.507059e+37 }
0x1354   :  { %v2071_v62 = vpop.eup %2070 }
0x1355   :  { %v1528_v51 = vadd.f32 1.0, %v2071_v62 }
0x1356   :  { %v2073_v20 = vpop.eup %2072 }
0x1357   :  { %2074 = vrcp.f32 %v1528_v51  ;;  %v1545_v52 = vmul.f32 %v2073_v20, %v1527_v48  ;;  %vm1550_vm7 = vweird.f32 %v2073_v20  ;;  %v1570_v44 = vand.u32 2147483648, %v1528_v51 }
0x1358   :  { %vm1551_vm9 = vmor %vm1549_vm8, %vm1550_vm7  ;;  %v1568_v7 = vand.u32 2147483647, %v1528_v51  ;;  %vm1564_vm14 = vweird.f32 %v1528_v51  ;;  %2076 = vpow2.f32 %v1915_v11  ;;  %vm1443_vm7 = vcmp.lt.s32.totalorder %v2462_v55, 96 }
0x1359   :  { %v1546_v56 = vsub.f32 1.0, %v1545_v52  ;;  %v1571_v53 = vor.u32 1.1754944e-38, %v1570_v44  ;;  %vm1444_vm8 = vmand %vm1442_vm6, %vm1443_vm7  ;;  %v1636_v52 = vld.sshfl [vmem:[#allocation1 + $0x10] sm:$0xff pattern:$0x73625140]  ;;  %vm1631_vm6 = vcmp.ge.s32.totalorder %v2462_v55, 64 }
0x135a   :  { %vm1569_vm1 = vcmp.eq.f32.partialorder %v1568_v7, 8.507059e+37 }
0x135b   :  { %v1547_v47 = vmul.f32 %v2073_v20, %v1546_v56 }
0x135d   :  { %v2075_v40 = vpop.eup %2074  ;;  %v1548_v34 = vadd.f32 %v2073_v20, %v1547_v47 }
0x135e   :  { %v1560_v43 = vmul.f32 %v2075_v40, %v1528_v51  ;;  %vm1565_vm11 = vweird.f32 %v2075_v40  ;;  %v2077_v3 = vpop.eup %2076 }
0x135f   :  { %v1552_v49 = vsel %vm1551_vm9, %v2073_v20, %v1548_v34  ;;  %vm1566_vm0 = vmor %vm1564_vm14, %vm1565_vm11  ;;  %v1526_v4 = vadd.f32 1.0, %v2077_v3 }
0x1360   :  { %v1561_v60 = vsub.f32 1.0, %v1560_v43  ;;  %v1557_v46 = vsel %vm1554_vm10, %v1556_v61, %v1552_v49 }
0x1361   :  { %v1574_v1 = vmul.f32 2.0, %v1557_v46  ;;  %2078 = vrcp.f32 %v1526_v4  ;;  %v1540_v18 = vand.u32 2147483648, %v1526_v4  ;;  %vm1534_vm3 = vweird.f32 %v1526_v4 }
0x1362   :  { %v1562_v2 = vmul.f32 %v2075_v40, %v1561_v60  ;;  %v1538_v19 = vand.u32 2147483647, %v1526_v4  ;;  %v1579_v31 = vmul.f32 %v1557_v46, %v2890_v27 }
0x1363   :  { %v1918_v39 = vadd.f32 -1.0, %v1574_v1  ;;  %v1541_v22 = vor.u32 1.1754944e-38, %v1540_v18 }
0x1364   :  { %v1563_v42 = vadd.f32 %v2075_v40, %v1562_v2  ;;  %vm1539_vm5 = vcmp.eq.f32.partialorder %v1538_v19, 8.507059e+37 }
0x1365   :  { %1582 = vrot.lane.b32.xlu0 %v1918_v39, %s2211_s1 }
0x1366   :  { %v1567_v5 = vsel %vm1566_vm0, %v2075_v40, %v1563_v42 }
0x1367   :  { %v1572_v50 = vsel %vm1569_vm1, %v1571_v53, %v1567_v5  ;;  %v2079_v13 = vpop.eup %2078 }
0x1368   :  { %v1575_v45 = vmul.f32 2.0, %v1572_v50  ;;  %v1530_v14 = vmul.f32 %v2079_v13, %v1526_v4  ;;  %vm1535_vm2 = vweird.f32 %v2079_v13 }
0x1369   :  { %vm1536_vm4 = vmor %vm1534_vm3, %vm1535_vm2 }
0x136a   :  { %v1919_v8 = vadd.f32 -1.0, %v1575_v45  ;;  %v1531_v15 = vsub.f32 1.0, %v1530_v14 }
0x136c   :  { %1584 = vrot.lane.b32.xlu1 %v1919_v8, %s2211_s1  ;;  %v1532_v16 = vmul.f32 %v2079_v13, %v1531_v15 }
0x136e   :  { %v1533_v17 = vadd.f32 %v2079_v13, %v1532_v16 }
0x1370   :  { %v1537_v21 = vsel %vm1536_vm4, %v2079_v13, %v1533_v17 }
0x1371   :  { %v1542_v28 = vsel %vm1539_vm5, %v1541_v22, %v1537_v21  ;;  %v1634_v21 = vld.sshfl [vmem:[#allocation1] sm:$0xff pattern:$0x73625140] }
0x1372   :  { %v1578_v30 = vmul.f32 %v1542_v28, %v2888_v26 }
0x13d7   :  { %v1583_v23 = vpop.permute.xlu0 %1582 }
0x13de   :  { %v1585_v24 = vpop.permute.xlu1 %1584 }
0x13df   :  { %v1586_v25 = vsel %vm234_vm12, %v1583_v23, %v1585_v24 }
0x13e0   :  { %v1588_v29 = vmul.f32 %v1586_v25, %v1542_v28 }
0x13e2   :  { %1590 = vrot.lane.b32.xlu2 %v1588_v29, %s2205_s25 }
0x143c   :  { %v1591_v57 = vpop.permute.xlu2 %1590 }
0x143d   :  { %v1593_v6 = vadd.f32 %v1591_v57, %v1578_v30  ;;  %v1594_v33 = vadd.f32 %v1591_v57, %v1579_v31 }
0x143f   :  { %2080 = vtanh.f32 %v1593_v6 }
0x1440   :  { %2082 = vtanh.f32 %v1594_v33 }
0x1445   :  { %v2081_v35 = vpop.eup %2080 }
0x1446   :  { %v2083_v36 = vpop.eup %2082  ;;  %1599 = vrot.lane.b32.xlu0 %v2081_v35, %s2211_s1 }
0x1447   :  { %1601 = vrot.lane.b32.xlu1 %v2083_v36, %s2211_s1 }
0x144e   :  { %1616 = vrot.lane.b32.xlu0 %v1593_v6, %s2212_s29 }
0x144f   :  { %1618 = vrot.lane.b32.xlu1 %v1594_v33, %s2212_s29 }
0x1456   :  { %1626 = vrot.lane.b32.xlu0 %v2890_v27, %s2212_s29 }
0x14b8   :  { %v1600_v37 = vpop.permute.xlu0 %1599 }
0x14b9   :  { %v1602_v38 = vpop.permute.xlu1 %1601 }
0x14ba   :  { %v1603_v58 = vsel %vm234_vm12, %v1600_v37, %v1602_v38 }
0x14bb   :  { %v1605_v59 = vmul.f32 %v1603_v58, %v1572_v50 }
0x14bd   :  { %1609 = vrot.lane.b32.xlu2 %v1605_v59, %s2205_s25 }
0x14c0   :  { %v1617_v41 = vpop.permute.xlu0 %1616 }
0x14c5   :  { %1624 = vrot.lane.b32.xlu2 %v2888_v26, %s2212_s29  ;;  %v1619_v26 = vpop.permute.xlu1 %1618 }
0x14c6   :  { %v1620_v62 = vsel %vm268_vm13, %v1617_v41, %v1619_v26 }
0x14c8   :  { %v1627_v0 = vpop.permute.xlu0 %1626 }
0x1517   :  { %v1610_v63 = vpop.permute.xlu2 %1609 }
0x1518   :  { %v2928_v27 = vsel %vm1444_vm8, %v1610_v63, %v2898_v32  ;;  %v1635_v32 = vld.sshfl [vmem:[#allocation1 + $0x8] sm:$0xff pattern:$0x73625140] }
0x1519   :  { %1920 = vmatmul.msk.f32.vlgmr.msra.gmra.mxu3 %vm101_vm15, %v2928_v27  ;;  %1921 = vmatmul.msk.f32.vlgmr.msrb.gmra.mxu0 %vm101_vm15, %v2928_v27 }
0x151a   :  { %1922 = vmatmul.msk.f32.vlgmr.msrb.gmra.mxu1 %vm101_vm15, %v2928_v27 }
0x151f   :  { %v1625_v48 = vpop.permute.xlu2 %1624 }
0x1520   :  { %v1628_v51 = vsel %vm268_vm13, %v1625_v48, %v1627_v0 }
0x1521   :  { %v1630_v20 = vsel %vm1444_vm8, %v1620_v62, %v1628_v51  ;;  %vm1632_vm8 = vmand %vm1631_vm6, %vm1443_vm7 }
0x1522   :  { %1765 = vrot.lane.b32.xlu0 %v1630_v20, %s2205_s25 }
0x1594   :  { %v1766_v26 = vpop.permute.xlu0 %1765 }
0x1596   :  { %v1680_v56 = vpop.f32.mrf.mxu0 }
0x1597   :  { %v1681_v54 = vadd.f32 %v1680_v56, %v1635_v32  ;;  %v1700_v47 = vpop.f32.mrf.mxu1  ;;  %v1938_v56 = vld [vmem:[%s2961_s2] ss:$0 sm:$0xff] }
0x1598   :  { %v1701_v12 = vadd.f32 %v1700_v47, %v1636_v52 }
0x1599   :  { %v1924_v40 = vmul.f32 -1.442695, %v1681_v54 }
0x159a   :  { %v1925_v43 = vmul.f32 -1.442695, %v1701_v12 }
0x159b   :  { %2084 = vpow2.f32 %v1924_v40 }
0x159c   :  { %2086 = vpow2.f32 %v1925_v43  ;;  %v1660_v22 = vpop.f32.mrf.mxu3 }
0x159d   :  { %v1661_v23 = vadd.f32 %v1660_v22, %v1634_v21 }
0x159f   :  { %v1923_v24 = vmul.f32 -1.442695, %v1661_v23 }
0x15a1   :  { %v2085_v34 = vpop.eup %2084 }
0x15a2   :  { %v2087_v61 = vpop.eup %2086  ;;  %v1713_v49 = vadd.f32 1.0, %v2085_v34 }
0x15a3   :  { %v1714_v60 = vadd.f32 1.0, %v2087_v61 }
0x15a4   :  { %2088 = vrcp.f32 %v1713_v49  ;;  %v1741_v42 = vand.u32 2147483648, %v1713_v49  ;;  %v1739_v50 = vand.u32 2147483647, %v1713_v49  ;;  %vm1735_vm9 = vweird.f32 %v1713_v49 }
0x15a5   :  { %2090 = vrcp.f32 %v1714_v60  ;;  %v1756_v53 = vand.u32 2147483648, %v1714_v60  ;;  %v1754_v8 = vand.u32 2147483647, %v1714_v60  ;;  %vm1750_vm10 = vweird.f32 %v1714_v60 }
0x15a6   :  { %v1742_v11 = vor.u32 1.1754944e-38, %v1741_v42  ;;  %vm1740_vm0 = vcmp.eq.f32.partialorder %v1739_v50, 8.507059e+37  ;;  %2092 = vpow2.f32 %v1923_v24 }
0x15a7   :  { %v1757_v3 = vor.u32 1.1754944e-38, %v1756_v53  ;;  %vm1755_vm1 = vcmp.eq.f32.partialorder %v1754_v8, 8.507059e+37 }
0x15aa   :  { %v2089_v46 = vpop.eup %2088 }
0x15ab   :  { %v2091_v44 = vpop.eup %2090  ;;  %v1731_v1 = vmul.f32 %v2089_v46, %v1713_v49  ;;  %vm1736_vm13 = vweird.f32 %v2089_v46 }
0x15ac   :  { %v1746_v2 = vmul.f32 %v2091_v44, %v1714_v60  ;;  %vm1751_vm15 = vweird.f32 %v2091_v44  ;;  %vm1737_vm11 = vmor %vm1735_vm9, %vm1736_vm13  ;;  %v2093_v25 = vpop.eup %2092  ;;  %vm1814_vm13 = vcmask 254976  }
0x15ad   :  { %v1732_v7 = vsub.f32 1.0, %v1731_v1  ;;  %vm1752_vm14 = vmor %vm1750_vm10, %vm1751_vm15  ;;  %v1712_v28 = vadd.f32 1.0, %v2093_v25  ;;  %vm1843_vm15 = vcmask 1024  }
0x15ae   :  { %v1747_v39 = vsub.f32 1.0, %v1746_v2 }
0x15af   :  { %v1733_v5 = vmul.f32 %v2089_v46, %v1732_v7  ;;  %2094 = vrcp.f32 %v1712_v28  ;;  %v1726_v33 = vand.u32 2147483648, %v1712_v28  ;;  %vm1720_vm3 = vweird.f32 %v1712_v28 }
0x15b0   :  { %v1748_v45 = vmul.f32 %v2091_v44, %v1747_v39  ;;  %v1724_v35 = vand.u32 2147483647, %v1712_v28 }
0x15b1   :  { %v1734_v9 = vadd.f32 %v2089_v46, %v1733_v5  ;;  %v1727_v37 = vor.u32 1.1754944e-38, %v1726_v33 }
0x15b2   :  { %v1749_v10 = vadd.f32 %v2091_v44, %v1748_v45  ;;  %vm1725_vm5 = vcmp.eq.f32.partialorder %v1724_v35, 8.507059e+37 }
0x15b3   :  { %v1738_v4 = vsel %vm1737_vm11, %v2089_v46, %v1734_v9 }
0x15b4   :  { %v1753_v13 = vsel %vm1752_vm14, %v2091_v44, %v1749_v10  ;;  %v1743_v14 = vsel %vm1740_vm0, %v1742_v11, %v1738_v4  ;;  %v1939_v44 = vld [vmem:[#allocation2] ss:$0 sm:$0xff] }
0x15b5   :  { %v1758_v15 = vsel %vm1755_vm1, %v1757_v3, %v1753_v13  ;;  %v1760_v16 = vmul.f32 2.0, %v1743_v14  ;;  %v2095_v29 = vpop.eup %2094  ;;  %v1769_v48 = vmul.f32 %v1766_v26, %v1743_v14 }
0x15b6   :  { %v1761_v17 = vmul.f32 2.0, %v1758_v15  ;;  %v1716_v30 = vmul.f32 %v2095_v29, %v1712_v28  ;;  %vm1721_vm2 = vweird.f32 %v2095_v29 }
0x15b7   :  { %v1926_v18 = vadd.f32 -1.0, %v1760_v16  ;;  %vm1722_vm4 = vmor %vm1720_vm3, %vm1721_vm2 }
0x15b8   :  { %v1927_v19 = vadd.f32 -1.0, %v1761_v17  ;;  %v1717_v31 = vsub.f32 1.0, %v1716_v30 }
0x15b9   :  { %1772 = vrot.lane.b32.xlu1 %v1926_v18, %s2211_s1 }
0x15ba   :  { %1774 = vrot.lane.b32.xlu2 %v1927_v19, %s2211_s1  ;;  %v1718_v57 = vmul.f32 %v2095_v29, %v1717_v31 }
0x15bc   :  { %v1719_v6 = vadd.f32 %v2095_v29, %v1718_v57 }
0x15be   :  { %v1723_v36 = vsel %vm1722_vm4, %v2095_v29, %v1719_v6 }
0x15bf   :  { %v1728_v41 = vsel %vm1725_vm5, %v1727_v37, %v1723_v36 }
0x15c0   :  { %v1768_v0 = vmul.f32 %v1766_v26, %v1728_v41 }
0x1614   :  { %v1775_v38 = vpop.permute.xlu2 %1774 }
0x162b   :  { %v1773_v58 = vpop.permute.xlu1 %1772 }
0x162c   :  { %v1776_v59 = vsel %vm234_vm12, %v1773_v58, %v1775_v38 }
0x162d   :  { %v1778_v63 = vmul.f32 %v1776_v59, %v1728_v41 }
0x162f   :  { %1780 = vrot.lane.b32.xlu1 %v1778_v63, %s2205_s25 }
0x16a1   :  { %v1781_v62 = vpop.permute.xlu1 %1780 }
0x16a2   :  { %v1783_v51 = vadd.f32 %v1781_v62, %v1768_v0  ;;  %v1784_v20 = vadd.f32 %v1781_v62, %v1769_v48 }
0x16a4   :  { %2096 = vtanh.f32 %v1783_v51 }
0x16a5   :  { %2098 = vtanh.f32 %v1784_v20 }
0x16aa   :  { %v2097_v32 = vpop.eup %2096 }
0x16ab   :  { %v2099_v52 = vpop.eup %2098  ;;  %1789 = vrot.lane.b32.xlu2 %v2097_v32, %s2211_s1 }
0x16ac   :  { %1791 = vrot.lane.b32.xlu0 %v2099_v52, %s2211_s1 }
0x16b3   :  { %1806 = vrot.lane.b32.xlu2 %v1938_v56, %s2211_s1 }
0x1705   :  { %v1790_v54 = vpop.permute.xlu2 %1789 }
0x170d   :  { %v1807_v43 = vpop.permute.xlu2 %1806 }
0x171e   :  { %v1792_v47 = vpop.permute.xlu0 %1791 }
0x171f   :  { %v1793_v12 = vsel %vm234_vm12, %v1790_v54, %v1792_v47 }
0x1720   :  { %v1795_v40 = vmul.f32 %v1793_v12, %v1758_v15 }
0x1722   :  { %1799 = vrot.lane.b32.xlu1 %v1795_v40, %s2205_s25 }
0x1794   :  { %v1800_v34 = vpop.permute.xlu1 %1799 }
0x1795   :  { %v1802_v61 = vsel %vm1632_vm8, %v1800_v34, %v2928_v27 }
0x1796   :  { %v1809_v49 = vmul.f32 %v1807_v43, %v1802_v61 }
0x1798   :  { %1811 = vrot.lane.b32.xlu0 %v1809_v49, %s2211_s1 }
0x180a   :  { %v1812_v60 = vpop.permute.xlu0 %1811 }
0x180b   :  { %v1815_v46 = vsel %vm1814_vm13, %v1812_v60, 0.0 }
0x180c   :  { %1816 = vadd.xlane.f32.xlu1 %v1815_v46 }
0x187f   :  { %v1817_v1 = vpop.xlane.xlu1 %1816 }
0x1880   :  { %v1822_v2 = vadd.f32 %v1939_v44, %v1817_v1 }
0x1882   :  { %v1823_v7 = vmax.f32 %v1822_v2, 0.0 }
0x1884   :  { %v1928_v39 = vmul.f32 -1.442695, %v1823_v7 }
0x1886   :  { %2100 = vpow2.f32 %v1928_v39 }
0x188c   :  { %v2101_v42 = vpop.eup %2100 }
0x188d   :  { %v1827_v55 = vadd.f32 1.0, %v2101_v42 }
0x188f   :  { %2102 = vrcp.f32 %v1827_v55  ;;  %v1839_v27 = vand.u32 2147483648, %v1827_v55  ;;  %v1837_v8 = vand.u32 2147483647, %v1827_v55  ;;  %vm1833_vm7 = vweird.f32 %v1827_v55 }
0x1891   :  { %v1840_v10 = vor.u32 1.1754944e-38, %v1839_v27  ;;  %vm1838_vm10 = vcmp.eq.f32.partialorder %v1837_v8, 8.507059e+37 }
0x1895   :  { %v2103_v53 = vpop.eup %2102 }
0x1896   :  { %v1829_v5 = vmul.f32 %v2103_v53, %v1827_v55  ;;  %vm1834_vm12 = vweird.f32 %v2103_v53 }
0x1897   :  { %vm1835_vm9 = vmor %vm1833_vm7, %vm1834_vm12 }
0x1898   :  { %v1830_v50 = vsub.f32 1.0, %v1829_v5 }
0x189a   :  { %v1831_v45 = vmul.f32 %v2103_v53, %v1830_v50 }
0x189c   :  { %v1832_v9 = vadd.f32 %v2103_v53, %v1831_v45 }
0x189e   :  { %v1836_v11 = vsel %vm1835_vm9, %v2103_v53, %v1832_v9 }
0x189f   :  { %v1841_v3 = vsel %vm1838_vm10, %v1840_v10, %v1836_v11 }
0x18a0   :  { %1844 = vst.msk [vmem:[%s2963_s4] sm:$0x3] %vm1843_vm15, %v1841_v3 }
0x18a1   :  { %1849 = vsyncpa [#allocation4], 1 }
0x18a2   :  { %1850 = vsyncpa [#allocation6], 1 }

</bundles_post_ra>
